<compile_context>
chip_gen: v5e
topology: v5e:2x2
jax: 0.10.0
libtpu: 0.0.40
codegen_flags: <defaults>
</compile_context>

<pallas_src>
import functools

import jax
import jax.numpy as jnp
import numpy as np
from jax.experimental import pallas as pl
from jax.experimental.pallas import tpu as pltpu

CPAD = 128      # lane-dense padding of the output (N) dimension
TILE_M = 256    # max rows per grid step


def _round_up(x, m):
    return ((x + m - 1) // m) * m


def _pick_tiling(M):
    """Choose (tm, Mp, nsteps) with minimal pad and tm % 16 == 0."""
    nsteps = -(-M // TILE_M)
    tm = _round_up(-(-M // nsteps), 16)
    return tm, tm * nsteps, nsteps


# ---------------------------------------------------------------------------
# Kernel 1: fused conv-as-matmul  (bf16 MXU, f32 acc, +bias, optional ReLU)
# ---------------------------------------------------------------------------
def _matmul_kernel(a_ref, b_ref, bias_ref, o_ref, *, post_relu):
    acc = jnp.dot(a_ref[...], b_ref[...], preferred_element_type=jnp.float32)
    acc = acc + bias_ref[...]
    if post_relu:
        acc = jnp.maximum(acc, 0.0)
    o_ref[...] = acc.astype(o_ref.dtype)


def matmul_bias(a, b, bias, *, post_relu=False, out_dtype=jnp.bfloat16):
    """(M,K) @ (K,Npad) + bias.  Npad % 128 == 0; K is the true (small) K."""
    M, K = a.shape
    Kb, Npad = b.shape
    assert K == Kb and Npad % 128 == 0
    tm, Mp, nsteps = _pick_tiling(M)
    a = a.astype(jnp.bfloat16)
    if Mp != M:
        a = jnp.pad(a, ((0, Mp - M), (0, 0)))
    out = pl.pallas_call(
        functools.partial(_matmul_kernel, post_relu=post_relu),
        out_shape=jax.ShapeDtypeStruct((Mp, Npad), out_dtype),
        grid=(nsteps,),
        in_specs=[
            pl.BlockSpec((tm, K), lambda i: (i, 0)),     # A rows stream
            pl.BlockSpec((K, Npad), lambda i: (0, 0)),   # weights resident
            pl.BlockSpec((1, Npad), lambda i: (0, 0)),   # bias resident
        ],
        out_specs=pl.BlockSpec((tm, Npad), lambda i: (i, 0)),
        compiler_params=pltpu.CompilerParams(
            dimension_semantics=("parallel",),
            vmem_limit_bytes=32 * 1024 * 1024,
        ),
    )(a, b.astype(jnp.bfloat16), bias.astype(jnp.float32))
    return out[:M] if Mp != M else out


# ---------------------------------------------------------------------------
# Kernel 2: fused residual layer
#   ReLU(x) -> 3x3 conv (no bias) -> ReLU -> 1x1 conv (no bias) -> + skip
#   (-> final ReLU on the last layer of the stack).  Intermediate stays on chip.
# ---------------------------------------------------------------------------
def _res_kernel(a_ref, b1_ref, b2_ref, skip_ref, o_ref, *, final_relu):
    a = jnp.maximum(a_ref[...], 0)                        # pre-ReLU on patches
    r = jnp.dot(a, b1_ref[...], preferred_element_type=jnp.float32)
    r = jnp.maximum(r, 0.0).astype(jnp.bfloat16)          # mid-ReLU
    acc = jnp.dot(r, b2_ref[...], preferred_element_type=jnp.float32)
    acc = acc + skip_ref[...].astype(jnp.float32)         # residual skip
    if final_relu:
        acc = jnp.maximum(acc, 0.0)
    o_ref[...] = acc.astype(o_ref.dtype)


def residual_layer(a1, b1, b2, skip, *, final_relu):
    M, K = a1.shape
    K1, R = b1.shape
    Rb, Npad = b2.shape
    assert K == K1 and R == Rb and Npad % 128 == 0
    tm, Mp, nsteps = _pick_tiling(M)
    a1 = a1.astype(jnp.bfloat16)
    skip = skip.astype(jnp.bfloat16)
    if Mp != M:
        a1 = jnp.pad(a1, ((0, Mp - M), (0, 0)))
        skip = jnp.pad(skip, ((0, Mp - M), (0, 0)))
    out = pl.pallas_call(
        functools.partial(_res_kernel, final_relu=final_relu),
        out_shape=jax.ShapeDtypeStruct((Mp, Npad), jnp.bfloat16),
        grid=(nsteps,),
        in_specs=[
            pl.BlockSpec((tm, K), lambda i: (i, 0)),      # patch rows
            pl.BlockSpec((K, R), lambda i: (0, 0)),       # 3x3 weights resident
            pl.BlockSpec((R, Npad), lambda i: (0, 0)),    # 1x1 weights resident
            pl.BlockSpec((tm, Npad), lambda i: (i, 0)),   # skip rows
        ],
        out_specs=pl.BlockSpec((tm, Npad), lambda i: (i, 0)),
        compiler_params=pltpu.CompilerParams(
            dimension_semantics=("parallel",),
            vmem_limit_bytes=32 * 1024 * 1024,
        ),
    )(a1, b1.astype(jnp.bfloat16), b2.astype(jnp.bfloat16), skip)
    return out[:M] if Mp != M else out


# ---------------------------------------------------------------------------
# Plain-JAX data-movement glue (patch gathers, depth-to-space)
# ---------------------------------------------------------------------------
def _im2col(x, kh, kw, stride, padding):
    """x: (N,H,W,C) -> (N*Ho*Wo, kh*kw*C) patch matrix."""
    Nb, H, W, C = x.shape
    Ho = (H + 2 * padding - kh) // stride + 1
    Wo = (W + 2 * padding - kw) // stride + 1
    xp = jnp.pad(x, ((0, 0), (padding, padding), (padding, padding), (0, 0)))
    taps = []
    for i in range(kh):
        for j in range(kw):
            taps.append(xp[:, i:i + stride * (Ho - 1) + 1:stride,
                              j:j + stride * (Wo - 1) + 1:stride, :])
    a = jnp.stack(taps, axis=3).reshape(Nb * Ho * Wo, kh * kw * C)
    return a, Ho, Wo


def _phase_taps(x):
    """2x2 taps of x (padded by 1 bottom/right) -> (N*H*W, 4*C) for phase convT."""
    Nb, H, W, C = x.shape
    xp = jnp.pad(x, ((0, 0), (0, 1), (0, 1), (0, 0)))
    taps = [xp[:, dy:dy + H, dx:dx + W, :] for dy in (0, 1) for dx in (0, 1)]
    return jnp.stack(taps, axis=3).reshape(Nb * H * W, 4 * C), H, W


def _depth_to_space(y_flat, Nb, H, W, C):
    """(N*H*W, 4*C) phase-stacked output -> (N, 2H-1, 2W-1, C)."""
    y = y_flat.reshape(Nb, H, W, 2, 2, C)
    y = jnp.transpose(y, (0, 1, 3, 2, 4, 5)).reshape(Nb, 2 * H, 2 * W, C)
    return y[:, :2 * H - 1, :2 * W - 1, :]


# ---------------------------------------------------------------------------
# One-time weight preparation (hoisted out of the forward path)
# ---------------------------------------------------------------------------
def _conv_w_to_mat(w_oihw, cout_pad=CPAD):
    """Conv2d weight (Cout,Cin,kh,kw) -> (kh*kw*Cin, cout_pad) matmul matrix."""
    Cout, Cin, kh, kw = w_oihw.shape
    wt = jnp.transpose(w_oihw, (2, 3, 1, 0))                       # (kh,kw,Cin,Cout)
    wt = jnp.pad(wt, ((0, 0), (0, 0), (0, 0), (0, cout_pad - Cout)))
    return wt.reshape(kh * kw * Cin, cout_pad).astype(jnp.bfloat16)


def _convT_s1_w_to_mat(w_iohw, cout_pad=CPAD):
    """ConvTranspose2d (stride 1) == conv with flipped kernel, pad k-1-p."""
    w_conv = jnp.transpose(w_iohw[:, :, ::-1, ::-1], (1, 0, 2, 3))
    return _conv_w_to_mat(w_conv, cout_pad)


# (phase, tap-offset) -> transposed-conv kernel spatial index (k=3, s=2, p=1)
_KY = {(0, 0): 1, (1, 0): 2, (1, 1): 0}


def _convT_s2_phase_mat(w_iohw, cout_pad=CPAD):
    """ConvTranspose2d(k=3,s=2,p=1) weight (Cin,Cout,3,3) -> phase-stacked B."""
    Cin, Cout, kh, kw = w_iohw.shape
    assert kh == 3 and kw == 3 and 4 * Cout <= cout_pad
    B = jnp.zeros((4 * Cin, cout_pad), jnp.float32)
    for py in (0, 1):
        for px in (0, 1):
            pidx = 2 * py + px
            for dy in (0, 1):
                for dx in (0, 1):
                    if (py, dy) not in _KY or (px, dx) not in _KY:
                        continue
                    ky, kx = _KY[(py, dy)], _KY[(px, dx)]
                    tap = 2 * dy + dx
                    B = B.at[tap * Cin:(tap + 1) * Cin,
                             pidx * Cout:(pidx + 1) * Cout].set(w_iohw[:, :, ky, kx])
    return B.astype(jnp.bfloat16)


def _pad_bias(b, n_pad=CPAD):
    return jnp.pad(b.astype(jnp.float32), (0, n_pad - b.shape[0])).reshape(1, n_pad)


def _phase_bias(b, n_pad=CPAD):
    return _pad_bias(jnp.tile(b, 4), n_pad)


def _res_w_to_mats(w1_oihw, w2_oihw, rpad=CPAD, cout_pad=CPAD):
    """Residual-layer weights -> (B1: 9*Cin x rpad, B2: rpad x cout_pad)."""
    B1 = _conv_w_to_mat(w1_oihw, rpad)                   # 3x3, Cout=res_h padded
    res_h = w2_oihw.shape[1]
    h = w2_oihw.shape[0]
    w2 = jnp.transpose(w2_oihw[:, :, 0, 0], (1, 0))      # (res_h, h)
    B2 = jnp.zeros((rpad, cout_pad), jnp.float32).at[:res_h, :h].set(w2)
    return B1, B2.astype(jnp.bfloat16)


def prepare_params(p):
    B1, B2 = _res_w_to_mats(p["res_w1"], p["res_w2"])
    return {
        "t1_B": _convT_s1_w_to_mat(p["t1_w"]), "t1_b": _pad_bias(p["t1_b"]),
        "res_B1": B1, "res_B2": B2,
        "t2_B": _convT_s2_phase_mat(p["t2_w"]), "t2_b": _phase_bias(p["t2_b"]),
        "t3_B": _convT_s2_phase_mat(p["t3_w"]), "t3_b": _phase_bias(p["t3_b"]),
    }


# ---------------------------------------------------------------------------
# Decoder forward (matches PyTorch Decoder.forward)
# ---------------------------------------------------------------------------
def decoder_forward(prep, x_nchw, *, n_res_layers, h_dim, out_dim):
    x = jnp.transpose(x_nchw, (0, 2, 3, 1)).astype(jnp.bfloat16)   # NCHW -> NHWC
    Nb, H, W, C = x.shape                                          # C == h_dim

    # ConvTranspose2d(h, h, k=2, s=1, p=1) == conv(flipped k=2, pad=0)
    a, Ho, Wo = _im2col(x, 2, 2, 1, 0)                             # K = 4*h_dim
    h = matmul_bias(a, prep["t1_B"], prep["t1_b"]).reshape(Nb, Ho, Wo, CPAD)

    # ResidualStack (shared weights); each layer = ONE fused pallas_call
    for layer in range(n_res_layers):
        a1, _, _ = _im2col(h[..., :h_dim], 3, 3, 1, 1)             # K = 9*h_dim
        hflat = residual_layer(a1, prep["res_B1"], prep["res_B2"],
                               h.reshape(-1, CPAD),
                               final_relu=(layer == n_res_layers - 1))
        h = hflat.reshape(Nb, Ho, Wo, CPAD)

    # ConvTranspose2d(h, h//2, k=3, s=2, p=1) + ReLU  (phase decomposed)
    c2 = h_dim // 2
    a, Hh, Wh = _phase_taps(h[..., :h_dim])                        # K = 4*h_dim
    y = matmul_bias(a, prep["t2_B"], prep["t2_b"], post_relu=True)
    h = _depth_to_space(y[:, :4 * c2], Nb, Hh, Wh, c2)             # real channels

    # ConvTranspose2d(h//2, out_dim, k=3, s=2, p=1)  (phase decomposed, bf16 out)
    a, Hh, Wh = _phase_taps(h)                                     # K = 4*(h//2)
    y = matmul_bias(a, prep["t3_B"], prep["t3_b"])
    y = _depth_to_space(y[:, :4 * out_dim], Nb, Hh, Wh, out_dim)
    return jnp.transpose(y, (0, 3, 1, 2)).astype(jnp.float32)      # NHWC -> NCHW


# ---------------------------------------------------------------------------
# Pure-JAX reference (correctness check only)
# ---------------------------------------------------------------------------
def _ref_conv(x, w_oihw, stride, padding):
    return jax.lax.conv_general_dilated(
        x, w_oihw, (stride, stride),
        [(padding, padding), (padding, padding)],
        dimension_numbers=("NHWC", "OIHW", "NHWC"))


def _ref_convT(x, w_iohw, b, stride, padding):
    _, _, kh, kw = w_iohw.shape
    w_conv = jnp.transpose(w_iohw[:, :, ::-1, ::-1], (1, 0, 2, 3))
    out = jax.lax.conv_general_dilated(
        x, w_conv, (1, 1),
        [(kh - 1 - padding, kh - 1 - padding), (kw - 1 - padding, kw - 1 - padding)],
        lhs_dilation=(stride, stride),
        dimension_numbers=("NHWC", "OIHW", "NHWC"))
    return out + b.reshape(1, 1, 1, -1)


def decoder_reference(p, x_nchw, *, n_res_layers):
    x = jnp.transpose(x_nchw, (0, 2, 3, 1)).astype(jnp.float32)
    h = _ref_convT(x, p["t1_w"], p["t1_b"], 1, 1)
    for _ in range(n_res_layers):
        r = _ref_conv(jax.nn.relu(h), p["res_w1"], 1, 1)
        r = _ref_conv(jax.nn.relu(r), p["res_w2"], 1, 0)
        h = h + r
    h = jax.nn.relu(h)
    h = jax.nn.relu(_ref_convT(h, p["t2_w"], p["t2_b"], 2, 1))
    y = _ref_convT(h, p["t3_w"], p["t3_b"], 2, 1)
    return jnp.transpose(y, (0, 3, 1, 2))


# ---------------------------------------------------------------------------
if __name__ == "__main__":
    # Decoder(in_dim, h_dim, out_dim, n_res_layers, res_h_dim); the module's
    # first layer is ConvTranspose2d(h_dim, h_dim, ...), so the decoder input
    # carries h_dim channels.
    h_dim, out_dim, n_res_layers, res_h_dim = 32, 3, 2, 16
    batch, spatial = 2, 8

    key = jax.random.PRNGKey(0)
    ks = jax.random.split(key, 9)

    def nrm(k, shape, scale=0.1):
        return scale * jax.random.normal(k, shape, dtype=jnp.float32)

    params = {  # PyTorch-native layouts
        "t1_w": nrm(ks[0], (h_dim, h_dim, 2, 2)),          "t1_b": nrm(ks[1], (h_dim,)),
        "res_w1": nrm(ks[2], (res_h_dim, h_dim, 3, 3)),    # Conv2d, bias=False
        "res_w2": nrm(ks[3], (h_dim, res_h_dim, 1, 1)),    # Conv2d, bias=False
        "t2_w": nrm(ks[4], (h_dim, h_dim // 2, 3, 3)),     "t2_b": nrm(ks[5], (h_dim // 2,)),
        "t3_w": nrm(ks[6], (h_dim // 2, out_dim, 3, 3)),   "t3_b": nrm(ks[7], (out_dim,)),
    }
    x = jax.random.normal(ks[8], (batch, h_dim, spatial, spatial), dtype=jnp.float32)

    prep = prepare_params(params)            # one-time weight transforms
    fwd = jax.jit(functools.partial(decoder_forward, n_res_layers=n_res_layers,
                                    h_dim=h_dim, out_dim=out_dim))
    y = fwd(prep, x)
    jax.block_until_ready(y)

    H1 = spatial - 1
    H3 = 2 * (2 * H1 - 1) - 1
    assert y.shape == (batch, out_dim, H3, H3), y.shape

    # Correctness check against a pure-JAX reference (bf16 operands -> loose tol).
    y_ref = decoder_reference(params, x, n_res_layers=n_res_layers)
    np.testing.assert_allclose(np.asarray(y), np.asarray(y_ref), rtol=0.1, atol=0.1)
    print("KERNEL_OK")
</pallas_src>

<mosaic_0001>
module attributes {stable_mosaic.version = 11 : i64} {
  func.func @_matmul_kernel(%arg0: i32, %arg1: memref<112x128xbf16, #tpu.memory_space<vmem>>, %arg2: memref<128x128xbf16, #tpu.memory_space<vmem>>, %arg3: memref<1x128xf32, #tpu.memory_space<vmem>>, %arg4: memref<112x128xbf16, #tpu.memory_space<vmem>>) attributes {dimension_semantics = [#tpu.dimension_semantics<parallel>], iteration_bounds = array<i64: 1>, scalar_prefetch = 0 : i64, scratch_operands = 0 : i64, tpu.core_type = #tpu.core_type<tc>, window_params = [{transform_indices = @transform_0, window_bounds = array<i64: 112, 128>}, {pipeline_mode = #tpu.pipeline_mode<synchronous>, transform_indices = @transform_1, window_bounds = array<i64: 128, 128>}, {pipeline_mode = #tpu.pipeline_mode<synchronous>, transform_indices = @transform_2, window_bounds = array<i64: 1, 128>}, {transform_indices = @transform_3, window_bounds = array<i64: 112, 128>}]} {
    %c0 = arith.constant 0 : index
    %c0_0 = arith.constant 0 : index
    %0 = vector.load %arg1[%c0, %c0_0] : memref<112x128xbf16, #tpu.memory_space<vmem>>, vector<112x128xbf16>
    %c0_1 = arith.constant 0 : index
    %c0_2 = arith.constant 0 : index
    %1 = vector.load %arg2[%c0_1, %c0_2] : memref<128x128xbf16, #tpu.memory_space<vmem>>, vector<128x128xbf16>
    %cst = arith.constant dense<0.000000e+00> : vector<112x128xf32>
    %2 = tpu.matmul %0, %1, %cst {dimension_numbers = #tpu.dot_dimension_numbers<[1], [0], [0], [1], [0, 0, 1, 1], [], []>} : vector<112x128xbf16>, vector<128x128xbf16>, vector<112x128xf32> -> vector<112x128xf32>
    %c0_3 = arith.constant 0 : index
    %c0_4 = arith.constant 0 : index
    %3 = vector.load %arg3[%c0_3, %c0_4] : memref<1x128xf32, #tpu.memory_space<vmem>>, vector<1x128xf32>
    %4 = vector.broadcast %3 : vector<1x128xf32> to vector<112x128xf32>
    %5 = arith.addf %2, %4 : vector<112x128xf32>
    %6 = arith.truncf %5 : vector<112x128xf32> to vector<112x128xbf16>
    %c0_5 = arith.constant 0 : index
    %c0_6 = arith.constant 0 : index
    %7 = vector.load %arg4[%c0_5, %c0_6] : memref<112x128xbf16, #tpu.memory_space<vmem>>, vector<112x128xbf16>
    tpu.vector_store %arg4[%c0_5, %c0_6], %6 {strides = array<i32>} : memref<112x128xbf16, #tpu.memory_space<vmem>>, vector<112x128xbf16>,
    return
  }
  func.func @transform_0(%arg0: i32) -> (i32, i32) {
    %c0_i32 = arith.constant 0 : i32
    %c0_i32_0 = arith.constant 0 : i32
    return %arg0, %c0_i32 : i32, i32
  }
  func.func @transform_1(%arg0: i32) -> (i32, i32) {
    %c0_i32 = arith.constant 0 : i32
    %c0_i32_0 = arith.constant 0 : i32
    %c0_i32_1 = arith.constant 0 : i32
    return %c0_i32, %c0_i32_0 : i32, i32
  }
  func.func @transform_2(%arg0: i32) -> (i32, i32) {
    %c0_i32 = arith.constant 0 : i32
    %c0_i32_0 = arith.constant 0 : i32
    %c0_i32_1 = arith.constant 0 : i32
    return %c0_i32, %c0_i32_0 : i32, i32
  }
  func.func @transform_3(%arg0: i32) -> (i32, i32) {
    %c0_i32 = arith.constant 0 : i32
    %c0_i32_0 = arith.constant 0 : i32
    return %arg0, %c0_i32 : i32, i32
  }
}

module attributes {stable_mosaic.version = 11 : i64} {
  func.func @_res_kernel(%arg0: i32, %arg1: memref<112x288xbf16, #tpu.memory_space<vmem>>, %arg2: memref<288x128xbf16, #tpu.memory_space<vmem>>, %arg3: memref<128x128xbf16, #tpu.memory_space<vmem>>, %arg4: memref<112x128xbf16, #tpu.memory_space<vmem>>, %arg5: memref<112x128xbf16, #tpu.memory_space<vmem>>) attributes {dimension_semantics = [#tpu.dimension_semantics<parallel>], iteration_bounds = array<i64: 1>, scalar_prefetch = 0 : i64, scratch_operands = 0 : i64, tpu.core_type = #tpu.core_type<tc>, window_params = [{transform_indices = @transform_0, window_bounds = array<i64: 112, 288>}, {pipeline_mode = #tpu.pipeline_mode<synchronous>, transform_indices = @transform_1, window_bounds = array<i64: 288, 128>}, {pipeline_mode = #tpu.pipeline_mode<synchronous>, transform_indices = @transform_2, window_bounds = array<i64: 128, 128>}, {transform_indices = @transform_3, window_bounds = array<i64: 112, 128>}, {transform_indices = @transform_4, window_bounds = array<i64: 112, 128>}]} {
    %c0 = arith.constant 0 : index
    %c0_0 = arith.constant 0 : index
    %0 = vector.load %arg1[%c0, %c0_0] : memref<112x288xbf16, #tpu.memory_space<vmem>>, vector<112x288xbf16>
    %cst = arith.constant 0.000000e+00 : bf16
    %1 = vector.broadcast %cst : bf16 to vector<112x288xbf16>
    %2 = arith.maximumf %0, %1 : vector<112x288xbf16>
    %c0_1 = arith.constant 0 : index
    %c0_2 = arith.constant 0 : index
    %3 = vector.load %arg2[%c0_1, %c0_2] : memref<288x128xbf16, #tpu.memory_space<vmem>>, vector<288x128xbf16>
    %cst_3 = arith.constant dense<0.000000e+00> : vector<112x128xf32>
    %4 = tpu.matmul %2, %3, %cst_3 {dimension_numbers = #tpu.dot_dimension_numbers<[1], [0], [0], [1], [0, 0, 1, 1], [], []>} : vector<112x288xbf16>, vector<288x128xbf16>, vector<112x128xf32> -> vector<112x128xf32>
    %cst_4 = arith.constant 0.000000e+00 : f32
    %5 = vector.broadcast %cst_4 : f32 to vector<112x128xf32>
    %6 = arith.maximumf %4, %5 : vector<112x128xf32>
    %7 = arith.truncf %6 : vector<112x128xf32> to vector<112x128xbf16>
    %c0_5 = arith.constant 0 : index
    %c0_6 = arith.constant 0 : index
    %8 = vector.load %arg3[%c0_5, %c0_6] : memref<128x128xbf16, #tpu.memory_space<vmem>>, vector<128x128xbf16>
    %cst_7 = arith.constant dense<0.000000e+00> : vector<112x128xf32>
    %9 = tpu.matmul %7, %8, %cst_7 {dimension_numbers = #tpu.dot_dimension_numbers<[1], [0], [0], [1], [0, 0, 1, 1], [], []>} : vector<112x128xbf16>, vector<128x128xbf16>, vector<112x128xf32> -> vector<112x128xf32>
    %c0_8 = arith.constant 0 : index
    %c0_9 = arith.constant 0 : index
    %10 = vector.load %arg4[%c0_8, %c0_9] : memref<112x128xbf16, #tpu.memory_space<vmem>>, vector<112x128xbf16>
    %11 = arith.extf %10 : vector<112x128xbf16> to vector<112x128xf32>
    %12 = arith.addf %9, %11 : vector<112x128xf32>
    %cst_10 = arith.constant 0.000000e+00 : f32
    %13 = vector.broadcast %cst_10 : f32 to vector<112x128xf32>
    %14 = arith.maximumf %12, %13 : vector<112x128xf32>
    %15 = arith.truncf %14 : vector<112x128xf32> to vector<112x128xbf16>
    %c0_11 = arith.constant 0 : index
    %c0_12 = arith.constant 0 : index
    %16 = vector.load %arg5[%c0_11, %c0_12] : memref<112x128xbf16, #tpu.memory_space<vmem>>, vector<112x128xbf16>
    tpu.vector_store %arg5[%c0_11, %c0_12], %15 {strides = array<i32>} : memref<112x128xbf16, #tpu.memory_space<vmem>>, vector<112x128xbf16>,
    return
  }
  func.func @transform_0(%arg0: i32) -> (i32, i32) {
    %c0_i32 = arith.constant 0 : i32
    %c0_i32_0 = arith.constant 0 : i32
    return %arg0, %c0_i32 : i32, i32
  }
  func.func @transform_1(%arg0: i32) -> (i32, i32) {
    %c0_i32 = arith.constant 0 : i32
    %c0_i32_0 = arith.constant 0 : i32
    %c0_i32_1 = arith.constant 0 : i32
    return %c0_i32, %c0_i32_0 : i32, i32
  }
  func.func @transform_2(%arg0: i32) -> (i32, i32) {
    %c0_i32 = arith.constant 0 : i32
    %c0_i32_0 = arith.constant 0 : i32
    %c0_i32_1 = arith.constant 0 : i32
    return %c0_i32, %c0_i32_0 : i32, i32
  }
  func.func @transform_3(%arg0: i32) -> (i32, i32) {
    %c0_i32 = arith.constant 0 : i32
    %c0_i32_0 = arith.constant 0 : i32
    return %arg0, %c0_i32 : i32, i32
  }
  func.func @transform_4(%arg0: i32) -> (i32, i32) {
    %c0_i32 = arith.constant 0 : i32
    %c0_i32_0 = arith.constant 0 : i32
    return %arg0, %c0_i32 : i32, i32
  }
}

module attributes {stable_mosaic.version = 11 : i64} {
  func.func @_res_kernel(%arg0: i32, %arg1: memref<112x288xbf16, #tpu.memory_space<vmem>>, %arg2: memref<288x128xbf16, #tpu.memory_space<vmem>>, %arg3: memref<128x128xbf16, #tpu.memory_space<vmem>>, %arg4: memref<112x128xbf16, #tpu.memory_space<vmem>>, %arg5: memref<112x128xbf16, #tpu.memory_space<vmem>>) attributes {dimension_semantics = [#tpu.dimension_semantics<parallel>], iteration_bounds = array<i64: 1>, scalar_prefetch = 0 : i64, scratch_operands = 0 : i64, tpu.core_type = #tpu.core_type<tc>, window_params = [{transform_indices = @transform_0, window_bounds = array<i64: 112, 288>}, {pipeline_mode = #tpu.pipeline_mode<synchronous>, transform_indices = @transform_1, window_bounds = array<i64: 288, 128>}, {pipeline_mode = #tpu.pipeline_mode<synchronous>, transform_indices = @transform_2, window_bounds = array<i64: 128, 128>}, {transform_indices = @transform_3, window_bounds = array<i64: 112, 128>}, {transform_indices = @transform_4, window_bounds = array<i64: 112, 128>}]} {
    %c0 = arith.constant 0 : index
    %c0_0 = arith.constant 0 : index
    %0 = vector.load %arg1[%c0, %c0_0] : memref<112x288xbf16, #tpu.memory_space<vmem>>, vector<112x288xbf16>
    %cst = arith.constant 0.000000e+00 : bf16
    %1 = vector.broadcast %cst : bf16 to vector<112x288xbf16>
    %2 = arith.maximumf %0, %1 : vector<112x288xbf16>
    %c0_1 = arith.constant 0 : index
    %c0_2 = arith.constant 0 : index
    %3 = vector.load %arg2[%c0_1, %c0_2] : memref<288x128xbf16, #tpu.memory_space<vmem>>, vector<288x128xbf16>
    %cst_3 = arith.constant dense<0.000000e+00> : vector<112x128xf32>
    %4 = tpu.matmul %2, %3, %cst_3 {dimension_numbers = #tpu.dot_dimension_numbers<[1], [0], [0], [1], [0, 0, 1, 1], [], []>} : vector<112x288xbf16>, vector<288x128xbf16>, vector<112x128xf32> -> vector<112x128xf32>
    %cst_4 = arith.constant 0.000000e+00 : f32
    %5 = vector.broadcast %cst_4 : f32 to vector<112x128xf32>
    %6 = arith.maximumf %4, %5 : vector<112x128xf32>
    %7 = arith.truncf %6 : vector<112x128xf32> to vector<112x128xbf16>
    %c0_5 = arith.constant 0 : index
    %c0_6 = arith.constant 0 : index
    %8 = vector.load %arg3[%c0_5, %c0_6] : memref<128x128xbf16, #tpu.memory_space<vmem>>, vector<128x128xbf16>
    %cst_7 = arith.constant dense<0.000000e+00> : vector<112x128xf32>
    %9 = tpu.matmul %7, %8, %cst_7 {dimension_numbers = #tpu.dot_dimension_numbers<[1], [0], [0], [1], [0, 0, 1, 1], [], []>} : vector<112x128xbf16>, vector<128x128xbf16>, vector<112x128xf32> -> vector<112x128xf32>
    %c0_8 = arith.constant 0 : index
    %c0_9 = arith.constant 0 : index
    %10 = vector.load %arg4[%c0_8, %c0_9] : memref<112x128xbf16, #tpu.memory_space<vmem>>, vector<112x128xbf16>
    %11 = arith.extf %10 : vector<112x128xbf16> to vector<112x128xf32>
    %12 = arith.addf %9, %11 : vector<112x128xf32>
    %13 = arith.truncf %12 : vector<112x128xf32> to vector<112x128xbf16>
    %c0_10 = arith.constant 0 : index
    %c0_11 = arith.constant 0 : index
    %14 = vector.load %arg5[%c0_10, %c0_11] : memref<112x128xbf16, #tpu.memory_space<vmem>>, vector<112x128xbf16>
    tpu.vector_store %arg5[%c0_10, %c0_11], %13 {strides = array<i32>} : memref<112x128xbf16, #tpu.memory_space<vmem>>, vector<112x128xbf16>,
    return
  }
  func.func @transform_0(%arg0: i32) -> (i32, i32) {
    %c0_i32 = arith.constant 0 : i32
    %c0_i32_0 = arith.constant 0 : i32
    return %arg0, %c0_i32 : i32, i32
  }
  func.func @transform_1(%arg0: i32) -> (i32, i32) {
    %c0_i32 = arith.constant 0 : i32
    %c0_i32_0 = arith.constant 0 : i32
    %c0_i32_1 = arith.constant 0 : i32
    return %c0_i32, %c0_i32_0 : i32, i32
  }
  func.func @transform_2(%arg0: i32) -> (i32, i32) {
    %c0_i32 = arith.constant 0 : i32
    %c0_i32_0 = arith.constant 0 : i32
    %c0_i32_1 = arith.constant 0 : i32
    return %c0_i32, %c0_i32_0 : i32, i32
  }
  func.func @transform_3(%arg0: i32) -> (i32, i32) {
    %c0_i32 = arith.constant 0 : i32
    %c0_i32_0 = arith.constant 0 : i32
    return %arg0, %c0_i32 : i32, i32
  }
  func.func @transform_4(%arg0: i32) -> (i32, i32) {
    %c0_i32 = arith.constant 0 : i32
    %c0_i32_0 = arith.constant 0 : i32
    return %arg0, %c0_i32 : i32, i32
  }
}

module attributes {stable_mosaic.version = 11 : i64} {
  func.func @_matmul_kernel(%arg0: i32, %arg1: memref<112x128xbf16, #tpu.memory_space<vmem>>, %arg2: memref<128x128xbf16, #tpu.memory_space<vmem>>, %arg3: memref<1x128xf32, #tpu.memory_space<vmem>>, %arg4: memref<112x128xbf16, #tpu.memory_space<vmem>>) attributes {dimension_semantics = [#tpu.dimension_semantics<parallel>], iteration_bounds = array<i64: 1>, scalar_prefetch = 0 : i64, scratch_operands = 0 : i64, tpu.core_type = #tpu.core_type<tc>, window_params = [{transform_indices = @transform_0, window_bounds = array<i64: 112, 128>}, {pipeline_mode = #tpu.pipeline_mode<synchronous>, transform_indices = @transform_1, window_bounds = array<i64: 128, 128>}, {pipeline_mode = #tpu.pipeline_mode<synchronous>, transform_indices = @transform_2, window_bounds = array<i64: 1, 128>}, {transform_indices = @transform_3, window_bounds = array<i64: 112, 128>}]} {
    %c0 = arith.constant 0 : index
    %c0_0 = arith.constant 0 : index
    %0 = vector.load %arg1[%c0, %c0_0] : memref<112x128xbf16, #tpu.memory_space<vmem>>, vector<112x128xbf16>
    %c0_1 = arith.constant 0 : index
    %c0_2 = arith.constant 0 : index
    %1 = vector.load %arg2[%c0_1, %c0_2] : memref<128x128xbf16, #tpu.memory_space<vmem>>, vector<128x128xbf16>
    %cst = arith.constant dense<0.000000e+00> : vector<112x128xf32>
    %2 = tpu.matmul %0, %1, %cst {dimension_numbers = #tpu.dot_dimension_numbers<[1], [0], [0], [1], [0, 0, 1, 1], [], []>} : vector<112x128xbf16>, vector<128x128xbf16>, vector<112x128xf32> -> vector<112x128xf32>
    %c0_3 = arith.constant 0 : index
    %c0_4 = arith.constant 0 : index
    %3 = vector.load %arg3[%c0_3, %c0_4] : memref<1x128xf32, #tpu.memory_space<vmem>>, vector<1x128xf32>
    %4 = vector.broadcast %3 : vector<1x128xf32> to vector<112x128xf32>
    %5 = arith.addf %2, %4 : vector<112x128xf32>
    %cst_5 = arith.constant 0.000000e+00 : f32
    %6 = vector.broadcast %cst_5 : f32 to vector<112x128xf32>
    %7 = arith.maximumf %5, %6 : vector<112x128xf32>
    %8 = arith.truncf %7 : vector<112x128xf32> to vector<112x128xbf16>
    %c0_6 = arith.constant 0 : index
    %c0_7 = arith.constant 0 : index
    %9 = vector.load %arg4[%c0_6, %c0_7] : memref<112x128xbf16, #tpu.memory_space<vmem>>, vector<112x128xbf16>
    tpu.vector_store %arg4[%c0_6, %c0_7], %8 {strides = array<i32>} : memref<112x128xbf16, #tpu.memory_space<vmem>>, vector<112x128xbf16>,
    return
  }
  func.func @transform_0(%arg0: i32) -> (i32, i32) {
    %c0_i32 = arith.constant 0 : i32
    %c0_i32_0 = arith.constant 0 : i32
    return %arg0, %c0_i32 : i32, i32
  }
  func.func @transform_1(%arg0: i32) -> (i32, i32) {
    %c0_i32 = arith.constant 0 : i32
    %c0_i32_0 = arith.constant 0 : i32
    %c0_i32_1 = arith.constant 0 : i32
    return %c0_i32, %c0_i32_0 : i32, i32
  }
  func.func @transform_2(%arg0: i32) -> (i32, i32) {
    %c0_i32 = arith.constant 0 : i32
    %c0_i32_0 = arith.constant 0 : i32
    %c0_i32_1 = arith.constant 0 : i32
    return %c0_i32, %c0_i32_0 : i32, i32
  }
  func.func @transform_3(%arg0: i32) -> (i32, i32) {
    %c0_i32 = arith.constant 0 : i32
    %c0_i32_0 = arith.constant 0 : i32
    return %arg0, %c0_i32 : i32, i32
  }
}

module attributes {stable_mosaic.version = 11 : i64} {
  func.func @_matmul_kernel(%arg0: i32, %arg1: memref<176x64xbf16, #tpu.memory_space<vmem>>, %arg2: memref<64x128xbf16, #tpu.memory_space<vmem>>, %arg3: memref<1x128xf32, #tpu.memory_space<vmem>>, %arg4: memref<176x128xbf16, #tpu.memory_space<vmem>>) attributes {dimension_semantics = [#tpu.dimension_semantics<parallel>], iteration_bounds = array<i64: 2>, scalar_prefetch = 0 : i64, scratch_operands = 0 : i64, tpu.core_type = #tpu.core_type<tc>, window_params = [{transform_indices = @transform_0, window_bounds = array<i64: 176, 64>}, {pipeline_mode = #tpu.pipeline_mode<synchronous>, transform_indices = @transform_1, window_bounds = array<i64: 64, 128>}, {pipeline_mode = #tpu.pipeline_mode<synchronous>, transform_indices = @transform_2, window_bounds = array<i64: 1, 128>}, {transform_indices = @transform_3, window_bounds = array<i64: 176, 128>}]} {
    %c0 = arith.constant 0 : index
    %c0_0 = arith.constant 0 : index
    %0 = vector.load %arg1[%c0, %c0_0] : memref<176x64xbf16, #tpu.memory_space<vmem>>, vector<176x64xbf16>
    %c0_1 = arith.constant 0 : index
    %c0_2 = arith.constant 0 : index
    %1 = vector.load %arg2[%c0_1, %c0_2] : memref<64x128xbf16, #tpu.memory_space<vmem>>, vector<64x128xbf16>
    %cst = arith.constant dense<0.000000e+00> : vector<176x128xf32>
    %2 = tpu.matmul %0, %1, %cst {dimension_numbers = #tpu.dot_dimension_numbers<[1], [0], [0], [1], [0, 0, 1, 1], [], []>} : vector<176x64xbf16>, vector<64x128xbf16>, vector<176x128xf32> -> vector<176x128xf32>
    %c0_3 = arith.constant 0 : index
    %c0_4 = arith.constant 0 : index
    %3 = vector.load %arg3[%c0_3, %c0_4] : memref<1x128xf32, #tpu.memory_space<vmem>>, vector<1x128xf32>
    %4 = vector.broadcast %3 : vector<1x128xf32> to vector<176x128xf32>
    %5 = arith.addf %2, %4 : vector<176x128xf32>
    %6 = arith.truncf %5 : vector<176x128xf32> to vector<176x128xbf16>
    %c0_5 = arith.constant 0 : index
    %c0_6 = arith.constant 0 : index
    %7 = vector.load %arg4[%c0_5, %c0_6] : memref<176x128xbf16, #tpu.memory_space<vmem>>, vector<176x128xbf16>
    tpu.vector_store %arg4[%c0_5, %c0_6], %6 {strides = array<i32>} : memref<176x128xbf16, #tpu.memory_space<vmem>>, vector<176x128xbf16>,
    return
  }
  func.func @transform_0(%arg0: i32) -> (i32, i32) {
    %c0_i32 = arith.constant 0 : i32
    %c0_i32_0 = arith.constant 0 : i32
    return %arg0, %c0_i32 : i32, i32
  }
  func.func @transform_1(%arg0: i32) -> (i32, i32) {
    %c0_i32 = arith.constant 0 : i32
    %c0_i32_0 = arith.constant 0 : i32
    %c0_i32_1 = arith.constant 0 : i32
    return %c0_i32, %c0_i32_0 : i32, i32
  }
  func.func @transform_2(%arg0: i32) -> (i32, i32) {
    %c0_i32 = arith.constant 0 : i32
    %c0_i32_0 = arith.constant 0 : i32
    %c0_i32_1 = arith.constant 0 : i32
    return %c0_i32, %c0_i32_0 : i32, i32
  }
  func.func @transform_3(%arg0: i32) -> (i32, i32) {
    %c0_i32 = arith.constant 0 : i32
    %c0_i32_0 = arith.constant 0 : i32
    return %arg0, %c0_i32 : i32, i32
  }
}

</mosaic_0001>

<bundles_post_ra>
// kernel: decoder_forward.5
= control target key start
LH: loop header
LB: loop body
LE: loop exit
PB: predicated region body
PF: predicated region fallthrough
CT: control target
= control target key end

     0   :  { %s444_s1 = inlined_call_operand.vmem [shape: bf16[128,128], index: 1, kind: input, shape index: {}]   ;;  %s445_s2 = inlined_call_operand.vmem [shape: f32[1,128], index: 2, kind: input, shape index: {}]   ;;  %s446_s0 = inlined_call_operand.vmem [shape: bf16[112,128], index: 0, kind: input, shape index: {}]   ;;  %s447_s3 = inlined_call_operand.vmem [shape: bf16[112,128], index: 3, kind: output, shape index: {}]  }
   0x1   :  { %v288_v0 = vld [vmem:[%s444_s1 + $0x38] sm:$0xff]  ;;  %v287_v1 = vld [vmem:[%s444_s1 + $0x30] sm:$0xff]  ;;  %v286_v2 = vld [vmem:[%s444_s1 + $0x28] sm:$0xff] }
   0x2   :  { %330 = vmatpush.bf16.msra.mxu1 %v288_v0  ;;  %331 = vmatpush.bf16.msra.mxu2 %v288_v0  ;;  %v285_v3 = vld [vmem:[%s444_s1 + $0x20] sm:$0xff]  ;;  %v284_v4 = vld [vmem:[%s444_s1 + $0x18] sm:$0xff]  ;;  %v283_v5 = vld [vmem:[%s444_s1 + $0x10] sm:$0xff] }
   0x3   :  { %332 = vmatpush.bf16.msra.mxu3 %v288_v0  ;;  %138 = vmatpush.bf16.msra.mxu0 %v288_v0  ;;  %v282_v6 = vld [vmem:[%s444_s1 + $0x8] sm:$0xff]  ;;  %v281_v7 = vld [vmem:[%s444_s1] sm:$0xff]  ;;  %v277_v9 = vld [vmem:[%s446_s0 + $0x18] sm:$0xff] }
   0x4   :  { %v275_v8 = vld [vmem:[%s446_s0 + $0x8] sm:$0xff]  ;;  %v274_v11 = vld [vmem:[%s446_s0] sm:$0xff]  ;;  %v276_v12 = vld [vmem:[%s446_s0 + $0x10] sm:$0xff] }
   0x5   :  { %v279_v10 = vld [vmem:[%s446_s0 + $0x28] sm:$0xff]  ;;  %v278_v13 = vld [vmem:[%s446_s0 + $0x20] sm:$0xff]  ;;  %v280_v14 = vld [vmem:[%s446_s0 + $0x30] sm:$0xff] }
   0x6   :  { %333 = vmatpush.bf16.msra.mxu1 %v287_v1  ;;  %334 = vmatpush.bf16.msra.mxu2 %v287_v1  ;;  %v354_v17 = vld [vmem:[%s445_s2] ss:$0 sm:$0xff] }
   0x7   :  { %335 = vmatpush.bf16.msra.mxu3 %v287_v1  ;;  %139 = vmatpush.bf16.msra.mxu0 %v287_v1 }
   0xa   :  { %336 = vmatpush.bf16.msra.mxu1 %v286_v2  ;;  %337 = vmatpush.bf16.msra.mxu2 %v286_v2 }
   0xb   :  { %338 = vmatpush.bf16.msra.mxu3 %v286_v2  ;;  %140 = vmatpush.bf16.msra.mxu0 %v286_v2 }
   0xe   :  { %339 = vmatpush.bf16.msra.mxu1 %v285_v3  ;;  %340 = vmatpush.bf16.msra.mxu2 %v285_v3 }
   0xf   :  { %341 = vmatpush.bf16.msra.mxu3 %v285_v3  ;;  %141 = vmatpush.bf16.msra.mxu0 %v285_v3 }
  0x12   :  { %342 = vmatpush.bf16.msra.mxu1 %v284_v4  ;;  %343 = vmatpush.bf16.msra.mxu2 %v284_v4 }
  0x13   :  { %344 = vmatpush.bf16.msra.mxu3 %v284_v4  ;;  %142 = vmatpush.bf16.msra.mxu0 %v284_v4 }
  0x16   :  { %345 = vmatpush.bf16.msra.mxu1 %v283_v5  ;;  %346 = vmatpush.bf16.msra.mxu2 %v283_v5 }
  0x17   :  { %347 = vmatpush.bf16.msra.mxu3 %v283_v5  ;;  %143 = vmatpush.bf16.msra.mxu0 %v283_v5 }
  0x1a   :  { %348 = vmatpush.bf16.msra.mxu1 %v282_v6  ;;  %349 = vmatpush.bf16.msra.mxu2 %v282_v6 }
  0x1b   :  { %350 = vmatpush.bf16.msra.mxu3 %v282_v6  ;;  %144 = vmatpush.bf16.msra.mxu0 %v282_v6 }
  0x1e   :  { %351 = vmatpush.bf16.msra.mxu1 %v281_v7  ;;  %352 = vmatpush.bf16.msra.mxu2 %v281_v7 }
  0x1f   :  { %353 = vmatpush.bf16.msra.mxu3 %v281_v7  ;;  %145 = vmatpush.bf16.msra.mxu0 %v281_v7 }
  0x21   :  { %151 = vmatmul.bf16.vlgmr.msra.gmra.mxu1 %v275_v8  ;;  %161 = vmatmul.bf16.vlgmr.msra.gmra.mxu2 %v277_v9 }
  0x22   :  { %171 = vmatmul.bf16.vlgmr.msra.gmra.mxu3 %v279_v10  ;;  %146 = vmatmul.bf16.vlgmr.msra.gmra.mxu0 %v274_v11 }
  0x31   :  { %156 = vmatmul.bf16.gmra.mxu1 %v276_v12  ;;  %166 = vmatmul.bf16.gmra.mxu2 %v278_v13 }
  0x32   :  { %176 = vmatmul.bf16.gmra.mxu3 %v280_v14 }
  0x9e   :  { %v152_v15 = vpop.f32.mrf.mxu1 }
  0x9f   :  { %v147_v16 = vpop.f32.mrf.mxu0  ;;  %v153_v22 = vadd.f32 %v354_v17, %v152_v15 }
  0xa0   :  { %v148_v21 = vadd.f32 %v354_v17, %v147_v16 }
  0xa4   :  { %v162_v18 = vpop.f32.mrf.mxu2 }
  0xa5   :  { %v172_v19 = vpop.f32.mrf.mxu3  ;;  %v163_v29 = vadd.f32 %v354_v17, %v162_v18 }
  0xa6   :  { %v154_v20 = vpop.f32.mrf.mxu1  ;;  %v173_v32 = vadd.f32 %v354_v17, %v172_v19 }
  0xa7   :  { %v155_v23 = vadd.f32 %v354_v17, %v154_v20  ;;  %v149_v24 = vpop.f32.mrf.mxu0 }
  0xa8   :  { %v150_v25 = vadd.f32 %v354_v17, %v149_v24 }
  0xa9   :  { %v297_v26 = vpack.c.bf16 %v155_v23, %v153_v22 }
  0xaa   :  { %v292_v27 = vpack.c.bf16 %v150_v25, %v148_v21 }
  0xab   :  { %324 = vst [vmem:[%s447_s3 + $0x8] sm:$0xff] %v297_v26  }
  0xac   :  { %v164_v28 = vpop.f32.mrf.mxu2  ;;  %293 = vst [vmem:[%s447_s3] sm:$0xff] %v292_v27  }
  0xad   :  { %v165_v30 = vadd.f32 %v354_v17, %v164_v28  ;;  %v174_v31 = vpop.f32.mrf.mxu3 }
  0xae   :  { %v175_v33 = vadd.f32 %v354_v17, %v174_v31  ;;  %v157_v34 = vpop.f32.mrf.mxu1 }
  0xaf   :  { %v307_v35 = vpack.c.bf16 %v165_v30, %v163_v29  ;;  %v158_v40 = vadd.f32 %v354_v17, %v157_v34 }
  0xb0   :  { %v317_v36 = vpack.c.bf16 %v175_v33, %v173_v32 }
  0xb1   :  { %326 = vst [vmem:[%s447_s3 + $0x18] sm:$0xff] %v307_v35  }
  0xb2   :  { %328 = vst [vmem:[%s447_s3 + $0x28] sm:$0xff] %v317_v36  }
  0xb4   :  { %v167_v37 = vpop.f32.mrf.mxu2 }
  0xb5   :  { %v177_v38 = vpop.f32.mrf.mxu3  ;;  %v168_v44 = vadd.f32 %v354_v17, %v167_v37 }
  0xb6   :  { %v159_v39 = vpop.f32.mrf.mxu1  ;;  %v178_v47 = vadd.f32 %v354_v17, %v177_v38 }
  0xb7   :  { %v160_v41 = vadd.f32 %v354_v17, %v159_v39 }
  0xb9   :  { %v302_v42 = vpack.c.bf16 %v160_v41, %v158_v40 }
  0xbb   :  { %325 = vst [vmem:[%s447_s3 + $0x10] sm:$0xff] %v302_v42  }
  0xbc   :  { %v169_v43 = vpop.f32.mrf.mxu2 }
  0xbd   :  { %v170_v45 = vadd.f32 %v354_v17, %v169_v43  ;;  %v179_v46 = vpop.f32.mrf.mxu3 }
  0xbe   :  { %v180_v48 = vadd.f32 %v354_v17, %v179_v46 }
  0xbf   :  { %v312_v49 = vpack.c.bf16 %v170_v45, %v168_v44 }
  0xc0   :  { %v322_v50 = vpack.c.bf16 %v180_v48, %v178_v47 }
  0xc1   :  { %327 = vst [vmem:[%s447_s3 + $0x20] sm:$0xff] %v312_v49  }
  0xc2   :  { %329 = vst [vmem:[%s447_s3 + $0x30] sm:$0xff] %v322_v50  }

// kernel: decoder_forward.6
= control target key start
LH: loop header
LB: loop body
LE: loop exit
PB: predicated region body
PF: predicated region fallthrough
CT: control target
= control target key end

     0   :  { %vm295_vm0 = vcmask 261120   ;;  %s1086_s1 = inlined_call_operand.vmem [shape: bf16[288,128], index: 1, kind: input, shape index: {}]   ;;  %s1087_s0 = inlined_call_operand.vmem [shape: bf16[112,288], index: 0, kind: input, shape index: {}]   ;;  %s1088_s2 = inlined_call_operand.vmem [shape: bf16[128,128], index: 2, kind: input, shape index: {}]   ;;  %s1089_s3 = inlined_call_operand.vmem [shape: bf16[112,128], index: 3, kind: input, shape index: {}]   ;;  %s1090_s4 = inlined_call_operand.vmem [shape: bf16[112,128], index: 4, kind: output, shape index: {}]  }
   0x1   :  { %v756_v0 = vld [vmem:[%s1086_s1 + $0x38] sm:$0xff]  ;;  %v755_v2 = vld [vmem:[%s1086_s1 + $0x30] sm:$0xff]  ;;  %v766_v4 = vld [vmem:[%s1086_s1 + $0x88] sm:$0xff] }
   0x2   :  { %v764_v1 = vld [vmem:[%s1086_s1 + $0x78] sm:$0xff]  ;;  %317 = vmatpush.bf16.msra.mxu0 %v756_v0  ;;  %v763_v3 = vld [vmem:[%s1086_s1 + $0x70] sm:$0xff]  ;;  %411 = vmatpush.bf16.msra.mxu2 %v766_v4  ;;  %v765_v5 = vld [vmem:[%s1086_s1 + $0x80] sm:$0xff] }
   0x3   :  { %361 = vmatpush.bf16.msra.mxu1 %v764_v1  ;;  %v19_v6 = vld [vmem:[%s1087_s0 + $0x8] sm:$0xf]  ;;  %v21_v7 = vld [vmem:[%s1087_s0 + $0x14] sm:$0xf]  ;;  %v753_v15 = vld [vmem:[%s1086_s1 + $0x20] sm:$0xff] }
   0x4   :  { %v48_v8 = vunpack.c.l.bf16 %v19_v6  ;;  %v51_v9 = vunpack.c.l.bf16 %v21_v7  ;;  %v754_v10 = vld [vmem:[%s1086_s1 + $0x28] sm:$0xff]  ;;  %v761_v16 = vld [vmem:[%s1086_s1 + $0x60] sm:$0xff]  ;;  %v752_v19 = vld [vmem:[%s1086_s1 + $0x18] sm:$0xff] }
   0x5   :  { %v762_v11 = vld [vmem:[%s1086_s1 + $0x68] sm:$0xff]  ;;  %v23_v17 = vld [vmem:[%s1087_s0 + $0x20] sm:$0xf]  ;;  %v760_v20 = vld [vmem:[%s1086_s1 + $0x58] sm:$0xff] }
   0x6   :  { %318 = vmatpush.bf16.msra.mxu0 %v755_v2  ;;  %v90_v12 = vmax.f32 %v48_v8, 0.0  ;;  %v93_v13 = vmax.f32 %v51_v9, 0.0  ;;  %412 = vmatpush.bf16.msra.mxu2 %v765_v5  ;;  %v25_v18 = vld [vmem:[%s1087_s0 + $0x2c] sm:$0xf]  ;;  %v54_v21 = vunpack.c.l.bf16 %v23_v17  ;;  %v751_v23 = vld [vmem:[%s1086_s1 + $0x10] sm:$0xff]  ;;  %v18_v25 = vld [vmem:[%s1087_s0] sm:$0xff] }
   0x7   :  { %362 = vmatpush.bf16.msra.mxu1 %v763_v3  ;;  %v57_v22 = vunpack.c.l.bf16 %v25_v18  ;;  %v759_v24 = vld [vmem:[%s1086_s1 + $0x50] sm:$0xff]  ;;  %v46_v29 = vunpack.c.l.bf16 %v18_v25  ;;  %v47_v31 = vunpack.c.h.bf16 %v18_v25  ;;  %v750_v33 = vld [vmem:[%s1086_s1 + $0x8] sm:$0xff]  ;;  %v749_v40 = vld [vmem:[%s1086_s1] sm:$0xff] }
   0x8   :  { %v132_v14 = vpack.c.bf16 %v93_v13, %v90_v12  ;;  %v20_v26 = vld [vmem:[%s1087_s0 + $0xc] sm:$0xff]  ;;  %v96_v27 = vmax.f32 %v54_v21, 0.0  ;;  %v757_v41 = vld [vmem:[%s1086_s1 + $0x40] sm:$0xff]  ;;  %v27_v42 = vld [vmem:[%s1087_s0 + $0x38] sm:$0xf] }
   0x9   :  { %v99_v28 = vmax.f32 %v57_v22, 0.0  ;;  %v49_v30 = vunpack.c.l.bf16 %v20_v26  ;;  %v50_v32 = vunpack.c.h.bf16 %v20_v26  ;;  %v758_v34 = vld [vmem:[%s1086_s1 + $0x48] sm:$0xff]  ;;  %v88_v36 = vmax.f32 %v46_v29, 0.0  ;;  %v29_v43 = vld [vmem:[%s1087_s0 + $0x44] sm:$0xf]  ;;  %v22_v48 = vld [vmem:[%s1087_s0 + $0x18] sm:$0xff] }
   0xa   :  { %319 = vmatpush.bf16.msra.mxu0 %v754_v10  ;;  %710 = vmatmul.msk.bf16.vlgmr.msra.gmra.mxu2 %vm295_vm0, %v132_v14  ;;  %v89_v38 = vmax.f32 %v47_v31, 0.0  ;;  %v60_v46 = vunpack.c.l.bf16 %v27_v42  ;;  %v63_v47 = vunpack.c.l.bf16 %v29_v43  ;;  %v24_v49 = vld [vmem:[%s1087_s0 + $0x24] sm:$0xff]  ;;  %v52_v52 = vunpack.c.l.bf16 %v22_v48  ;;  %v31_v61 = vld [vmem:[%s1087_s0 + $0x50] sm:$0xf]  ;;  %v33_v62 = vld [vmem:[%s1087_s0 + $0x5c] sm:$0xf] }
   0xb   :  { %363 = vmatpush.bf16.msra.mxu1 %v762_v11  ;;  %v135_v35 = vpack.c.bf16 %v99_v28, %v96_v27  ;;  %v91_v37 = vmax.f32 %v49_v30, 0.0  ;;  %v92_v39 = vmax.f32 %v50_v32, 0.0  ;;  %v55_v53 = vunpack.c.l.bf16 %v24_v49  ;;  %v26_v3 = vld [vmem:[%s1087_s0 + $0x30] sm:$0xff]  ;;  %v28_v4 = vld [vmem:[%s1087_s0 + $0x3c] sm:$0xff]  ;;  %v30_v22 = vld [vmem:[%s1087_s0 + $0x48] sm:$0xff] }
   0xc   :  { %v102_v50 = vmax.f32 %v60_v46, 0.0  ;;  %v105_v51 = vmax.f32 %v63_v47, 0.0  ;;  %v53_v54 = vunpack.c.h.bf16 %v22_v48  ;;  %v56_v55 = vunpack.c.h.bf16 %v24_v49  ;;  %v37_v17 = vld [vmem:[%s1087_s0 + $0x74] sm:$0xf]  ;;  %v36_v42 = vld [vmem:[%s1087_s0 + $0x6c] sm:$0xff] }
   0xd   :  { %v130_v44 = vpack.c.bf16 %v91_v37, %v88_v36  ;;  %v131_v45 = vpack.c.bf16 %v92_v39, %v89_v38  ;;  %v94_v57 = vmax.f32 %v52_v52, 0.0  ;;  %v97_v58 = vmax.f32 %v55_v53, 0.0  ;;  %v41_v36 = vld [vmem:[%s1087_s0 + $0x8c] sm:$0xf] }
   0xe   :  { %320 = vmatpush.bf16.msra.mxu0 %v753_v15  ;;  %v138_v56 = vpack.c.bf16 %v105_v51, %v102_v50  ;;  %v95_v59 = vmax.f32 %v53_v54, 0.0  ;;  %v98_v60 = vmax.f32 %v56_v55, 0.0  ;;  %v66_v1 = vunpack.c.l.bf16 %v31_v61  ;;  %v43_v54 = vld [vmem:[%s1087_s0 + $0x98] sm:$0xf]  ;;  %v45_v55 = vld [vmem:[%s1087_s0 + $0xa4] sm:$0xf] }
   0xf   :  { %364 = vmatpush.bf16.msra.mxu1 %v761_v16  ;;  %v133_v63 = vpack.c.bf16 %v97_v58, %v94_v57  ;;  %v69_v2 = vunpack.c.l.bf16 %v33_v62  ;;  %v58_v7 = vunpack.c.l.bf16 %v26_v3  ;;  %v61_v8 = vunpack.c.l.bf16 %v28_v4  ;;  %v35_v16 = vld [vmem:[%s1087_s0 + $0x68] sm:$0xf]  ;;  %v38_v61 = vld [vmem:[%s1087_s0 + $0x78] sm:$0xff] }
  0x10   :  { %v134_v0 = vpack.c.bf16 %v98_v60, %v95_v59  ;;  %v108_v5 = vmax.f32 %v66_v1, 0.0  ;;  %v59_v9 = vunpack.c.h.bf16 %v26_v3  ;;  %v62_v10 = vunpack.c.h.bf16 %v28_v4  ;;  %v774_v60 = vld [vmem:[%s1088_s2 + $0x38] sm:$0xff]  ;;  %v40_v62 = vld [vmem:[%s1087_s0 + $0x84] sm:$0xff]  ;;  %v773_v1 = vld [vmem:[%s1088_s2 + $0x30] sm:$0xff] }
  0x11   :  { %v111_v6 = vmax.f32 %v69_v2, 0.0  ;;  %v100_v12 = vmax.f32 %v58_v7, 0.0  ;;  %v103_v13 = vmax.f32 %v61_v8, 0.0  ;;  %v75_v21 = vunpack.c.l.bf16 %v37_v17  ;;  %562 = vmatpush.bf16.msra.mxu3 %v774_v60 }
  0x12   :  { %321 = vmatpush.bf16.msra.mxu0 %v752_v19  ;;  %v101_v14 = vmax.f32 %v59_v9, 0.0  ;;  %v104_v15 = vmax.f32 %v62_v10, 0.0  ;;  %v64_v26 = vunpack.c.l.bf16 %v30_v22  ;;  %v65_v28 = vunpack.c.h.bf16 %v30_v22 }
  0x13   :  { %365 = vmatpush.bf16.msra.mxu1 %v760_v20  ;;  %v141_v11 = vpack.c.bf16 %v111_v6, %v108_v5  ;;  %v136_v18 = vpack.c.bf16 %v103_v13, %v100_v12  ;;  %v72_v20 = vunpack.c.l.bf16 %v35_v16  ;;  %v117_v25 = vmax.f32 %v75_v21, 0.0  ;;  %v772_v13 = vld [vmem:[%s1088_s2 + $0x28] sm:$0xff]  ;;  %v44_v16 = vld [vmem:[%s1087_s0 + $0x9c] sm:$0xff] }
  0x14   :  { %v137_v19 = vpack.c.bf16 %v104_v15, %v101_v14  ;;  %v106_v31 = vmax.f32 %v64_v26, 0.0  ;;  %v73_v46 = vunpack.c.l.bf16 %v36_v42  ;;  %v74_v48 = vunpack.c.h.bf16 %v36_v42  ;;  %v771_v14 = vld [vmem:[%s1088_s2 + $0x20] sm:$0xff]  ;;  %v42_v15 = vld [vmem:[%s1087_s0 + $0x90] sm:$0xff] }
  0x15   :  { %v84_v58 = vunpack.c.l.bf16 %v43_v54  ;;  %v87_v59 = vunpack.c.l.bf16 %v45_v55  ;;  %v76_v2 = vunpack.c.l.bf16 %v38_v61  ;;  %v79_v3 = vunpack.c.l.bf16 %v40_v62  ;;  %563 = vmatpush.bf16.msra.mxu3 %v773_v1 }
  0x16   :  { %322 = vmatpush.bf16.msra.mxu0 %v751_v23  ;;  %v32_v23 = vld [vmem:[%s1087_s0 + $0x54] sm:$0xff]  ;;  %v115_v51 = vmax.f32 %v73_v46, 0.0  ;;  %v116_v53 = vmax.f32 %v74_v48, 0.0  ;;  %v77_v4 = vunpack.c.h.bf16 %v38_v61  ;;  %v80_v5 = vunpack.c.h.bf16 %v40_v62 }
  0x17   :  { %366 = vmatpush.bf16.msra.mxu1 %v759_v24  ;;  %v114_v24 = vmax.f32 %v72_v20, 0.0  ;;  %v67_v27 = vunpack.c.l.bf16 %v32_v23  ;;  %v68_v29 = vunpack.c.h.bf16 %v32_v23  ;;  %v118_v7 = vmax.f32 %v76_v2, 0.0 }
  0x18   :  { %v121_v8 = vmax.f32 %v79_v3, 0.0  ;;  %v119_v9 = vmax.f32 %v77_v4, 0.0  ;;  %v122_v10 = vmax.f32 %v80_v5, 0.0  ;;  %v82_v17 = vunpack.c.l.bf16 %v42_v15 }
  0x19   :  { %v144_v30 = vpack.c.bf16 %v117_v25, %v114_v24  ;;  %v109_v32 = vmax.f32 %v67_v27, 0.0  ;;  %564 = vmatpush.bf16.msra.mxu3 %v772_v13  ;;  %v86_v20 = vunpack.c.h.bf16 %v44_v16  ;;  %v770_v27 = vld [vmem:[%s1088_s2 + $0x18] sm:$0xff] }
  0x1a   :  { %323 = vmatpush.bf16.msra.mxu0 %v750_v33  ;;  %711 = vmatmul.msk.bf16.gmra.mxu2 %vm295_vm0, %v135_v35  ;;  %v107_v33 = vmax.f32 %v65_v28, 0.0  ;;  %v39_v35 = vld [vmem:[%s1087_s0 + $0x80] sm:$0xf]  ;;  %v146_v12 = vpack.c.bf16 %v122_v10, %v119_v9  ;;  %v124_v21 = vmax.f32 %v82_v17, 0.0  ;;  %v769_v28 = vld [vmem:[%s1088_s2 + $0x10] sm:$0xff] }
  0x1b   :  { %367 = vmatpush.bf16.msra.mxu1 %v758_v34  ;;  %v110_v34 = vmax.f32 %v68_v29, 0.0  ;;  %v139_v37 = vpack.c.bf16 %v109_v32, %v106_v31  ;;  %v78_v39 = vunpack.c.l.bf16 %v39_v35  ;;  %v128_v24 = vmax.f32 %v86_v20, 0.0  ;;  %v768_v29 = vld [vmem:[%s1088_s2 + $0x8] sm:$0xff] }
  0x1d   :  { %v140_v38 = vpack.c.bf16 %v110_v34, %v107_v33  ;;  %v120_v43 = vmax.f32 %v78_v39, 0.0  ;;  %565 = vmatpush.bf16.msra.mxu3 %v771_v14 }
  0x1e   :  { %324 = vmatpush.bf16.msra.mxu0 %v749_v40  ;;  %v81_v40 = vunpack.c.l.bf16 %v41_v36 }
  0x1f   :  { %368 = vmatpush.bf16.msra.mxu1 %v757_v41  ;;  %v34_v41 = vld [vmem:[%s1087_s0 + $0x60] sm:$0xff] }
  0x20   :  { %v71_v47 = vunpack.c.h.bf16 %v34_v41 }
  0x21   :  { %325 = vmatmul.bf16.vlgmr.msra.gmra.mxu0 %v130_v44  ;;  %v123_v44 = vmax.f32 %v81_v40, 0.0  ;;  %566 = vmatpush.bf16.msra.mxu3 %v770_v27 }
  0x22   :  { %369 = vmatmul.bf16.vlgmr.msra.gmra.mxu1 %v131_v45  ;;  %v70_v45 = vunpack.c.l.bf16 %v34_v41  ;;  %v113_v52 = vmax.f32 %v71_v47, 0.0 }
  0x23   :  { %v147_v49 = vpack.c.bf16 %v123_v44, %v120_v43 }
  0x24   :  { %v112_v50 = vmax.f32 %v70_v45, 0.0  ;;  %v143_v57 = vpack.c.bf16 %v116_v53, %v113_v52 }
  0x25   :  { %567 = vmatpush.bf16.msra.mxu3 %v769_v28 }
  0x29   :  { %568 = vmatpush.bf16.msra.mxu3 %v768_v29 }
  0x2a   :  { %712 = vmatmul.msk.bf16.gmra.mxu2 %vm295_vm0, %v138_v56  ;;  %v142_v56 = vpack.c.bf16 %v115_v51, %v112_v50 }
  0x31   :  { %330 = vmatmul.bf16.gmra.mxu0 %v133_v63  ;;  %v126_v63 = vmax.f32 %v84_v58, 0.0 }
  0x32   :  { %374 = vmatmul.bf16.gmra.mxu1 %v134_v0  ;;  %v129_v0 = vmax.f32 %v87_v59, 0.0 }
  0x34   :  { %v150_v6 = vpack.c.bf16 %v129_v0, %v126_v63 }
  0x3a   :  { %713 = vmatmul.msk.bf16.gmra.mxu2 %vm295_vm0, %v141_v11  ;;  %v145_v11 = vpack.c.bf16 %v121_v8, %v118_v7 }
  0x41   :  { %335 = vmatmul.bf16.gmra.mxu0 %v136_v18  ;;  %v85_v18 = vunpack.c.l.bf16 %v44_v16 }
  0x42   :  { %379 = vmatmul.bf16.gmra.mxu1 %v137_v19  ;;  %v83_v19 = vunpack.c.h.bf16 %v42_v15 }
  0x43   :  { %v127_v22 = vmax.f32 %v85_v18, 0.0 }
  0x44   :  { %v125_v23 = vmax.f32 %v83_v19, 0.0 }
  0x45   :  { %v148_v25 = vpack.c.bf16 %v127_v22, %v124_v21 }
  0x46   :  { %v149_v26 = vpack.c.bf16 %v128_v24, %v125_v23 }
  0x4a   :  { %714 = vmatmul.msk.bf16.gmra.mxu2 %vm295_vm0, %v144_v30  ;;  %v767_v30 = vld [vmem:[%s1088_s2] sm:$0xff] }
  0x4b   :  { %569 = vmatpush.bf16.msra.mxu3 %v767_v30 }
  0x51   :  { %340 = vmatmul.bf16.gmra.mxu0 %v139_v37 }
  0x52   :  { %384 = vmatmul.bf16.gmra.mxu1 %v140_v38 }
  0x5a   :  { %715 = vmatmul.msk.bf16.gmra.mxu2 %vm295_vm0, %v147_v49 }
  0x61   :  { %345 = vmatmul.bf16.gmra.mxu0 %v142_v56 }
  0x62   :  { %389 = vmatmul.bf16.gmra.mxu1 %v143_v57 }
  0x6a   :  { %716 = vmatmul.msk.bf16.gmra.mxu2 %vm295_vm0, %v150_v6 }
  0x71   :  { %350 = vmatmul.bf16.gmra.mxu0 %v145_v11 }
  0x72   :  { %394 = vmatmul.bf16.gmra.mxu1 %v146_v12 }
  0x81   :  { %355 = vmatmul.bf16.gmra.mxu0 %v148_v25 }
  0x82   :  { %399 = vmatmul.bf16.gmra.mxu1 %v149_v26 }
  0x8d   :  { %v414_v31 = vpop.f32.mrf.mxu2 }
  0x95   :  { %v416_v32 = vpop.f32.mrf.mxu2 }
  0x9d   :  { %v419_v35 = vpop.f32.mrf.mxu2 }
  0x9e   :  { %v326_v33 = vpop.f32.mrf.mxu0 }
  0x9f   :  { %v370_v34 = vpop.f32.mrf.mxu1 }
  0xa0   :  { %v371_v36 = vadd.f32 %v370_v34, %v326_v33 }
  0xa2   :  { %v415_v39 = vadd.f32 %v414_v31, %v371_v36 }
  0xa4   :  { %v449_v43 = vmax.f32 %v415_v39, 0.0 }
  0xa5   :  { %v421_v41 = vpop.f32.mrf.mxu2 }
  0xa6   :  { %v328_v37 = vpop.f32.mrf.mxu0 }
  0xa7   :  { %v372_v38 = vpop.f32.mrf.mxu1 }
  0xa8   :  { %v373_v40 = vadd.f32 %v372_v38, %v328_v37 }
  0xaa   :  { %v417_v42 = vadd.f32 %v416_v32, %v373_v40 }
  0xac   :  { %v450_v44 = vmax.f32 %v417_v42, 0.0 }
  0xad   :  { %v424_v48 = vpop.f32.mrf.mxu2 }
  0xae   :  { %v463_v45 = vpack.c.bf16 %v450_v44, %v449_v43  ;;  %v331_v46 = vpop.f32.mrf.mxu0 }
  0xaf   :  { %v375_v47 = vpop.f32.mrf.mxu1 }
  0xb0   :  { %570 = vmatmul.bf16.vlgmr.msra.gmra.mxu3 %v463_v45  ;;  %v376_v49 = vadd.f32 %v375_v47, %v331_v46 }
  0xb2   :  { %v420_v52 = vadd.f32 %v419_v35, %v376_v49 }
  0xb4   :  { %v451_v56 = vmax.f32 %v420_v52, 0.0 }
  0xb5   :  { %v426_v54 = vpop.f32.mrf.mxu2 }
  0xb6   :  { %v333_v50 = vpop.f32.mrf.mxu0 }
  0xb7   :  { %v377_v51 = vpop.f32.mrf.mxu1 }
  0xb8   :  { %v378_v53 = vadd.f32 %v377_v51, %v333_v50 }
  0xba   :  { %v422_v55 = vadd.f32 %v421_v41, %v378_v53 }
  0xbc   :  { %v452_v57 = vmax.f32 %v422_v55, 0.0 }
  0xbd   :  { %v429_v61 = vpop.f32.mrf.mxu2 }
  0xbe   :  { %v464_v58 = vpack.c.bf16 %v452_v57, %v451_v56  ;;  %v336_v59 = vpop.f32.mrf.mxu0 }
  0xbf   :  { %v380_v60 = vpop.f32.mrf.mxu1 }
  0xc0   :  { %575 = vmatmul.bf16.gmra.mxu3 %v464_v58  ;;  %v381_v62 = vadd.f32 %v380_v60, %v336_v59  ;;  %v776_v59 = vld [vmem:[%s1089_s3] sm:$0xff]  }
  0xc1   :  { %v777_v60 = vunpack.c.l.bf16 %v776_v59 }
  0xc2   :  { %v425_v1 = vadd.f32 %v424_v48, %v381_v62 }
  0xc4   :  { %v453_v4 = vmax.f32 %v425_v1, 0.0 }
  0xc5   :  { %v431_v6 = vpop.f32.mrf.mxu2 }
  0xc6   :  { %v338_v63 = vpop.f32.mrf.mxu0 }
  0xc7   :  { %v382_v0 = vpop.f32.mrf.mxu1 }
  0xc8   :  { %v383_v2 = vadd.f32 %v382_v0, %v338_v63 }
  0xca   :  { %v427_v3 = vadd.f32 %v426_v54, %v383_v2 }
  0xcc   :  { %v454_v5 = vmax.f32 %v427_v3, 0.0  ;;  %v838_v3 = vld [vmem:[%s1089_s3 + $0x8] sm:$0xff]  }
  0xcd   :  { %v434_v11 = vpop.f32.mrf.mxu2 }
  0xce   :  { %v465_v7 = vpack.c.bf16 %v454_v5, %v453_v4  ;;  %v341_v8 = vpop.f32.mrf.mxu0  ;;  %v781_v4 = vunpack.c.l.bf16 %v838_v3  ;;  %v782_v5 = vunpack.c.h.bf16 %v838_v3 }
  0xcf   :  { %v385_v9 = vpop.f32.mrf.mxu1 }
  0xd0   :  { %580 = vmatmul.bf16.gmra.mxu3 %v465_v7  ;;  %v386_v10 = vadd.f32 %v385_v9, %v341_v8 }
  0xd2   :  { %v430_v14 = vadd.f32 %v429_v61, %v386_v10  ;;  %v778_v61 = vunpack.c.h.bf16 %v776_v59 }
  0xd4   :  { %v455_v17 = vmax.f32 %v430_v14, 0.0 }
  0xd5   :  { %v436_v22 = vpop.f32.mrf.mxu2 }
  0xd6   :  { %v343_v12 = vpop.f32.mrf.mxu0 }
  0xd7   :  { %v387_v13 = vpop.f32.mrf.mxu1 }
  0xd8   :  { %v388_v15 = vadd.f32 %v387_v13, %v343_v12 }
  0xda   :  { %v432_v16 = vadd.f32 %v431_v6, %v388_v15 }
  0xdc   :  { %v456_v18 = vmax.f32 %v432_v16, 0.0 }
  0xdd   :  { %v439_v29 = vpop.f32.mrf.mxu2 }
  0xde   :  { %v466_v19 = vpack.c.bf16 %v456_v18, %v455_v17  ;;  %v346_v20 = vpop.f32.mrf.mxu0 }
  0xdf   :  { %v390_v21 = vpop.f32.mrf.mxu1 }
  0xe0   :  { %585 = vmatmul.bf16.gmra.mxu3 %v466_v19  ;;  %v391_v23 = vadd.f32 %v390_v21, %v346_v20  ;;  %v840_v19 = vld [vmem:[%s1089_s3 + $0x18] sm:$0xff]  }
  0xe1   :  { %v789_v20 = vunpack.c.l.bf16 %v840_v19  ;;  %v790_v21 = vunpack.c.h.bf16 %v840_v19 }
  0xe2   :  { %v435_v26 = vadd.f32 %v434_v11, %v391_v23  ;;  %v839_v11 = vld [vmem:[%s1089_s3 + $0x10] sm:$0xff]  }
  0xe3   :  { %v785_v12 = vunpack.c.l.bf16 %v839_v11  ;;  %v786_v13 = vunpack.c.h.bf16 %v839_v11 }
  0xe4   :  { %v457_v30 = vmax.f32 %v435_v26, 0.0 }
  0xe5   :  { %v441_v36 = vpop.f32.mrf.mxu2 }
  0xe6   :  { %v348_v24 = vpop.f32.mrf.mxu0 }
  0xe7   :  { %v392_v25 = vpop.f32.mrf.mxu1 }
  0xe8   :  { %v393_v27 = vadd.f32 %v392_v25, %v348_v24 }
  0xea   :  { %v437_v28 = vadd.f32 %v436_v22, %v393_v27  ;;  %v841_v27 = vld [vmem:[%s1089_s3 + $0x20] sm:$0xff]  }
  0xec   :  { %v458_v31 = vmax.f32 %v437_v28, 0.0  ;;  %v793_v28 = vunpack.c.l.bf16 %v841_v27 }
  0xed   :  { %v444_v44 = vpop.f32.mrf.mxu2 }
  0xee   :  { %v467_v32 = vpack.c.bf16 %v458_v31, %v457_v30  ;;  %v351_v33 = vpop.f32.mrf.mxu0 }
  0xef   :  { %v395_v34 = vpop.f32.mrf.mxu1 }
  0xf0   :  { %590 = vmatmul.bf16.gmra.mxu3 %v467_v32  ;;  %v396_v35 = vadd.f32 %v395_v34, %v351_v33 }
  0xf2   :  { %v440_v39 = vadd.f32 %v439_v29, %v396_v35  ;;  %v794_v29 = vunpack.c.h.bf16 %v841_v27  ;;  %v842_v35 = vld [vmem:[%s1089_s3 + $0x28] sm:$0xff]  }
  0xf4   :  { %v459_v42 = vmax.f32 %v440_v39, 0.0 }
  0xf5   :  { %v446_v53 = vpop.f32.mrf.mxu2 }
  0xf6   :  { %v353_v37 = vpop.f32.mrf.mxu0 }
  0xf7   :  { %v397_v38 = vpop.f32.mrf.mxu1 }
  0xf8   :  { %v398_v40 = vadd.f32 %v397_v38, %v353_v37  ;;  %v798_v37 = vunpack.c.h.bf16 %v842_v35 }
  0xfa   :  { %v442_v41 = vadd.f32 %v441_v36, %v398_v40  ;;  %v797_v36 = vunpack.c.l.bf16 %v842_v35 }
  0xfc   :  { %v460_v43 = vmax.f32 %v442_v41, 0.0 }
  0xfe   :  { %v468_v45 = vpack.c.bf16 %v460_v43, %v459_v42  ;;  %v356_v46 = vpop.f32.mrf.mxu0  ;;  %v843_v43 = vld [vmem:[%s1089_s3 + $0x30] sm:$0xff]  }
  0xff   :  { %v400_v47 = vpop.f32.mrf.mxu1 }
 0x100   :  { %595 = vmatmul.bf16.gmra.mxu3 %v468_v45  ;;  %v401_v48 = vadd.f32 %v400_v47, %v356_v46  ;;  %v802_v45 = vunpack.c.h.bf16 %v843_v43 }
 0x102   :  { %v445_v51 = vadd.f32 %v444_v44, %v401_v48  ;;  %v801_v44 = vunpack.c.l.bf16 %v843_v43 }
 0x104   :  { %v461_v55 = vmax.f32 %v445_v51, 0.0 }
 0x106   :  { %v358_v49 = vpop.f32.mrf.mxu0 }
 0x107   :  { %v402_v50 = vpop.f32.mrf.mxu1 }
 0x108   :  { %v403_v52 = vadd.f32 %v402_v50, %v358_v49 }
 0x10a   :  { %v447_v54 = vadd.f32 %v446_v53, %v403_v52 }
 0x10c   :  { %v462_v56 = vmax.f32 %v447_v54, 0.0 }
 0x10e   :  { %v469_v57 = vpack.c.bf16 %v462_v56, %v461_v55 }
 0x110   :  { %600 = vmatmul.bf16.gmra.mxu3 %v469_v57 }
 0x133   :  { %v571_v58 = vpop.f32.mrf.mxu3 }
 0x134   :  { %v572_v63 = vadd.f32 %v777_v60, %v571_v58 }
 0x13b   :  { %v573_v62 = vpop.f32.mrf.mxu3 }
 0x13c   :  { %v574_v0 = vadd.f32 %v778_v61, %v573_v62 }
 0x13e   :  { %v806_v1 = vpack.c.bf16 %v574_v0, %v572_v63 }
 0x140   :  { %807 = vst [vmem:[%s1090_s4] sm:$0xff] %v806_v1  }
 0x143   :  { %v576_v2 = vpop.f32.mrf.mxu3 }
 0x144   :  { %v577_v7 = vadd.f32 %v781_v4, %v576_v2 }
 0x14b   :  { %v578_v6 = vpop.f32.mrf.mxu3 }
 0x14c   :  { %v579_v8 = vadd.f32 %v782_v5, %v578_v6 }
 0x14e   :  { %v811_v9 = vpack.c.bf16 %v579_v8, %v577_v7 }
 0x150   :  { %844 = vst [vmem:[%s1090_s4 + $0x8] sm:$0xff] %v811_v9  }
 0x153   :  { %v581_v10 = vpop.f32.mrf.mxu3 }
 0x154   :  { %v582_v15 = vadd.f32 %v785_v12, %v581_v10 }
 0x15b   :  { %v583_v14 = vpop.f32.mrf.mxu3 }
 0x15c   :  { %v584_v16 = vadd.f32 %v786_v13, %v583_v14 }
 0x15e   :  { %v816_v17 = vpack.c.bf16 %v584_v16, %v582_v15 }
 0x160   :  { %845 = vst [vmem:[%s1090_s4 + $0x10] sm:$0xff] %v816_v17  }
 0x163   :  { %v586_v18 = vpop.f32.mrf.mxu3 }
 0x164   :  { %v587_v23 = vadd.f32 %v789_v20, %v586_v18 }
 0x16b   :  { %v588_v22 = vpop.f32.mrf.mxu3 }
 0x16c   :  { %v589_v24 = vadd.f32 %v790_v21, %v588_v22 }
 0x16e   :  { %v821_v25 = vpack.c.bf16 %v589_v24, %v587_v23 }
 0x170   :  { %846 = vst [vmem:[%s1090_s4 + $0x18] sm:$0xff] %v821_v25  }
 0x173   :  { %v591_v26 = vpop.f32.mrf.mxu3 }
 0x174   :  { %v592_v31 = vadd.f32 %v793_v28, %v591_v26 }
 0x17b   :  { %v593_v30 = vpop.f32.mrf.mxu3 }
 0x17c   :  { %v594_v32 = vadd.f32 %v794_v29, %v593_v30 }
 0x17e   :  { %v826_v33 = vpack.c.bf16 %v594_v32, %v592_v31 }
 0x180   :  { %847 = vst [vmem:[%s1090_s4 + $0x20] sm:$0xff] %v826_v33  }
 0x183   :  { %v596_v34 = vpop.f32.mrf.mxu3 }
 0x184   :  { %v597_v39 = vadd.f32 %v797_v36, %v596_v34 }
 0x18b   :  { %v598_v38 = vpop.f32.mrf.mxu3 }
 0x18c   :  { %v599_v40 = vadd.f32 %v798_v37, %v598_v38 }
 0x18e   :  { %v831_v41 = vpack.c.bf16 %v599_v40, %v597_v39 }
 0x190   :  { %848 = vst [vmem:[%s1090_s4 + $0x28] sm:$0xff] %v831_v41  }
 0x193   :  { %v601_v42 = vpop.f32.mrf.mxu3 }
 0x194   :  { %v602_v47 = vadd.f32 %v801_v44, %v601_v42 }
 0x19b   :  { %v603_v46 = vpop.f32.mrf.mxu3 }
 0x19c   :  { %v604_v48 = vadd.f32 %v802_v45, %v603_v46 }
 0x19e   :  { %v836_v49 = vpack.c.bf16 %v604_v48, %v602_v47 }
 0x1a0   :  { %849 = vst [vmem:[%s1090_s4 + $0x30] sm:$0xff] %v836_v49  }

// kernel: decoder_forward.7
= control target key start
LH: loop header
LB: loop body
LE: loop exit
PB: predicated region body
PF: predicated region fallthrough
CT: control target
= control target key end

     0   :  { %vm295_vm0 = vcmask 261120   ;;  %s1100_s1 = inlined_call_operand.vmem [shape: bf16[288,128], index: 1, kind: input, shape index: {}]   ;;  %s1101_s0 = inlined_call_operand.vmem [shape: bf16[112,288], index: 0, kind: input, shape index: {}]   ;;  %s1102_s2 = inlined_call_operand.vmem [shape: bf16[128,128], index: 2, kind: input, shape index: {}]   ;;  %s1103_s3 = inlined_call_operand.vmem [shape: bf16[112,128], index: 3, kind: input, shape index: {}]   ;;  %s1104_s4 = inlined_call_operand.vmem [shape: bf16[112,128], index: 4, kind: output, shape index: {}]  }
   0x1   :  { %v770_v0 = vld [vmem:[%s1100_s1 + $0x38] sm:$0xff]  ;;  %v769_v2 = vld [vmem:[%s1100_s1 + $0x30] sm:$0xff]  ;;  %v780_v4 = vld [vmem:[%s1100_s1 + $0x88] sm:$0xff] }
   0x2   :  { %v778_v1 = vld [vmem:[%s1100_s1 + $0x78] sm:$0xff]  ;;  %317 = vmatpush.bf16.msra.mxu0 %v770_v0  ;;  %v777_v3 = vld [vmem:[%s1100_s1 + $0x70] sm:$0xff]  ;;  %411 = vmatpush.bf16.msra.mxu2 %v780_v4  ;;  %v779_v5 = vld [vmem:[%s1100_s1 + $0x80] sm:$0xff] }
   0x3   :  { %361 = vmatpush.bf16.msra.mxu1 %v778_v1  ;;  %v19_v6 = vld [vmem:[%s1101_s0 + $0x8] sm:$0xf]  ;;  %v21_v7 = vld [vmem:[%s1101_s0 + $0x14] sm:$0xf]  ;;  %v767_v15 = vld [vmem:[%s1100_s1 + $0x20] sm:$0xff] }
   0x4   :  { %v48_v8 = vunpack.c.l.bf16 %v19_v6  ;;  %v51_v9 = vunpack.c.l.bf16 %v21_v7  ;;  %v768_v10 = vld [vmem:[%s1100_s1 + $0x28] sm:$0xff]  ;;  %v775_v16 = vld [vmem:[%s1100_s1 + $0x60] sm:$0xff]  ;;  %v766_v19 = vld [vmem:[%s1100_s1 + $0x18] sm:$0xff] }
   0x5   :  { %v776_v11 = vld [vmem:[%s1100_s1 + $0x68] sm:$0xff]  ;;  %v23_v17 = vld [vmem:[%s1101_s0 + $0x20] sm:$0xf]  ;;  %v774_v20 = vld [vmem:[%s1100_s1 + $0x58] sm:$0xff] }
   0x6   :  { %318 = vmatpush.bf16.msra.mxu0 %v769_v2  ;;  %v90_v12 = vmax.f32 %v48_v8, 0.0  ;;  %v93_v13 = vmax.f32 %v51_v9, 0.0  ;;  %412 = vmatpush.bf16.msra.mxu2 %v779_v5  ;;  %v25_v18 = vld [vmem:[%s1101_s0 + $0x2c] sm:$0xf]  ;;  %v54_v21 = vunpack.c.l.bf16 %v23_v17  ;;  %v765_v23 = vld [vmem:[%s1100_s1 + $0x10] sm:$0xff]  ;;  %v18_v25 = vld [vmem:[%s1101_s0] sm:$0xff] }
   0x7   :  { %362 = vmatpush.bf16.msra.mxu1 %v777_v3  ;;  %v57_v22 = vunpack.c.l.bf16 %v25_v18  ;;  %v773_v24 = vld [vmem:[%s1100_s1 + $0x50] sm:$0xff]  ;;  %v46_v29 = vunpack.c.l.bf16 %v18_v25  ;;  %v47_v31 = vunpack.c.h.bf16 %v18_v25  ;;  %v764_v33 = vld [vmem:[%s1100_s1 + $0x8] sm:$0xff]  ;;  %v763_v40 = vld [vmem:[%s1100_s1] sm:$0xff] }
   0x8   :  { %v132_v14 = vpack.c.bf16 %v93_v13, %v90_v12  ;;  %v20_v26 = vld [vmem:[%s1101_s0 + $0xc] sm:$0xff]  ;;  %v96_v27 = vmax.f32 %v54_v21, 0.0  ;;  %v771_v41 = vld [vmem:[%s1100_s1 + $0x40] sm:$0xff]  ;;  %v27_v42 = vld [vmem:[%s1101_s0 + $0x38] sm:$0xf] }
   0x9   :  { %v99_v28 = vmax.f32 %v57_v22, 0.0  ;;  %v49_v30 = vunpack.c.l.bf16 %v20_v26  ;;  %v50_v32 = vunpack.c.h.bf16 %v20_v26  ;;  %v772_v34 = vld [vmem:[%s1100_s1 + $0x48] sm:$0xff]  ;;  %v88_v36 = vmax.f32 %v46_v29, 0.0  ;;  %v29_v43 = vld [vmem:[%s1101_s0 + $0x44] sm:$0xf]  ;;  %v22_v48 = vld [vmem:[%s1101_s0 + $0x18] sm:$0xff] }
   0xa   :  { %319 = vmatpush.bf16.msra.mxu0 %v768_v10  ;;  %724 = vmatmul.msk.bf16.vlgmr.msra.gmra.mxu2 %vm295_vm0, %v132_v14  ;;  %v89_v38 = vmax.f32 %v47_v31, 0.0  ;;  %v60_v46 = vunpack.c.l.bf16 %v27_v42  ;;  %v63_v47 = vunpack.c.l.bf16 %v29_v43  ;;  %v24_v49 = vld [vmem:[%s1101_s0 + $0x24] sm:$0xff]  ;;  %v52_v52 = vunpack.c.l.bf16 %v22_v48  ;;  %v31_v61 = vld [vmem:[%s1101_s0 + $0x50] sm:$0xf]  ;;  %v33_v62 = vld [vmem:[%s1101_s0 + $0x5c] sm:$0xf] }
   0xb   :  { %363 = vmatpush.bf16.msra.mxu1 %v776_v11  ;;  %v135_v35 = vpack.c.bf16 %v99_v28, %v96_v27  ;;  %v91_v37 = vmax.f32 %v49_v30, 0.0  ;;  %v92_v39 = vmax.f32 %v50_v32, 0.0  ;;  %v55_v53 = vunpack.c.l.bf16 %v24_v49  ;;  %v26_v3 = vld [vmem:[%s1101_s0 + $0x30] sm:$0xff]  ;;  %v28_v4 = vld [vmem:[%s1101_s0 + $0x3c] sm:$0xff]  ;;  %v30_v22 = vld [vmem:[%s1101_s0 + $0x48] sm:$0xff] }
   0xc   :  { %v102_v50 = vmax.f32 %v60_v46, 0.0  ;;  %v105_v51 = vmax.f32 %v63_v47, 0.0  ;;  %v53_v54 = vunpack.c.h.bf16 %v22_v48  ;;  %v56_v55 = vunpack.c.h.bf16 %v24_v49  ;;  %v37_v17 = vld [vmem:[%s1101_s0 + $0x74] sm:$0xf]  ;;  %v36_v42 = vld [vmem:[%s1101_s0 + $0x6c] sm:$0xff] }
   0xd   :  { %v130_v44 = vpack.c.bf16 %v91_v37, %v88_v36  ;;  %v131_v45 = vpack.c.bf16 %v92_v39, %v89_v38  ;;  %v94_v57 = vmax.f32 %v52_v52, 0.0  ;;  %v97_v58 = vmax.f32 %v55_v53, 0.0  ;;  %v41_v36 = vld [vmem:[%s1101_s0 + $0x8c] sm:$0xf] }
   0xe   :  { %320 = vmatpush.bf16.msra.mxu0 %v767_v15  ;;  %v138_v56 = vpack.c.bf16 %v105_v51, %v102_v50  ;;  %v95_v59 = vmax.f32 %v53_v54, 0.0  ;;  %v98_v60 = vmax.f32 %v56_v55, 0.0  ;;  %v66_v1 = vunpack.c.l.bf16 %v31_v61  ;;  %v43_v54 = vld [vmem:[%s1101_s0 + $0x98] sm:$0xf]  ;;  %v45_v55 = vld [vmem:[%s1101_s0 + $0xa4] sm:$0xf] }
   0xf   :  { %364 = vmatpush.bf16.msra.mxu1 %v775_v16  ;;  %v133_v63 = vpack.c.bf16 %v97_v58, %v94_v57  ;;  %v69_v2 = vunpack.c.l.bf16 %v33_v62  ;;  %v58_v7 = vunpack.c.l.bf16 %v26_v3  ;;  %v61_v8 = vunpack.c.l.bf16 %v28_v4  ;;  %v35_v16 = vld [vmem:[%s1101_s0 + $0x68] sm:$0xf]  ;;  %v38_v61 = vld [vmem:[%s1101_s0 + $0x78] sm:$0xff] }
  0x10   :  { %v134_v0 = vpack.c.bf16 %v98_v60, %v95_v59  ;;  %v108_v5 = vmax.f32 %v66_v1, 0.0  ;;  %v59_v9 = vunpack.c.h.bf16 %v26_v3  ;;  %v62_v10 = vunpack.c.h.bf16 %v28_v4  ;;  %v788_v60 = vld [vmem:[%s1102_s2 + $0x38] sm:$0xff]  ;;  %v40_v62 = vld [vmem:[%s1101_s0 + $0x84] sm:$0xff]  ;;  %v787_v1 = vld [vmem:[%s1102_s2 + $0x30] sm:$0xff] }
  0x11   :  { %v111_v6 = vmax.f32 %v69_v2, 0.0  ;;  %v100_v12 = vmax.f32 %v58_v7, 0.0  ;;  %v103_v13 = vmax.f32 %v61_v8, 0.0  ;;  %v75_v21 = vunpack.c.l.bf16 %v37_v17  ;;  %562 = vmatpush.bf16.msra.mxu3 %v788_v60 }
  0x12   :  { %321 = vmatpush.bf16.msra.mxu0 %v766_v19  ;;  %v101_v14 = vmax.f32 %v59_v9, 0.0  ;;  %v104_v15 = vmax.f32 %v62_v10, 0.0  ;;  %v64_v26 = vunpack.c.l.bf16 %v30_v22  ;;  %v65_v28 = vunpack.c.h.bf16 %v30_v22 }
  0x13   :  { %365 = vmatpush.bf16.msra.mxu1 %v774_v20  ;;  %v141_v11 = vpack.c.bf16 %v111_v6, %v108_v5  ;;  %v136_v18 = vpack.c.bf16 %v103_v13, %v100_v12  ;;  %v72_v20 = vunpack.c.l.bf16 %v35_v16  ;;  %v117_v25 = vmax.f32 %v75_v21, 0.0  ;;  %v786_v13 = vld [vmem:[%s1102_s2 + $0x28] sm:$0xff]  ;;  %v44_v16 = vld [vmem:[%s1101_s0 + $0x9c] sm:$0xff] }
  0x14   :  { %v137_v19 = vpack.c.bf16 %v104_v15, %v101_v14  ;;  %v106_v31 = vmax.f32 %v64_v26, 0.0  ;;  %v73_v46 = vunpack.c.l.bf16 %v36_v42  ;;  %v74_v48 = vunpack.c.h.bf16 %v36_v42  ;;  %v785_v14 = vld [vmem:[%s1102_s2 + $0x20] sm:$0xff]  ;;  %v42_v15 = vld [vmem:[%s1101_s0 + $0x90] sm:$0xff] }
  0x15   :  { %v84_v58 = vunpack.c.l.bf16 %v43_v54  ;;  %v87_v59 = vunpack.c.l.bf16 %v45_v55  ;;  %v76_v2 = vunpack.c.l.bf16 %v38_v61  ;;  %v79_v3 = vunpack.c.l.bf16 %v40_v62  ;;  %563 = vmatpush.bf16.msra.mxu3 %v787_v1 }
  0x16   :  { %322 = vmatpush.bf16.msra.mxu0 %v765_v23  ;;  %v32_v23 = vld [vmem:[%s1101_s0 + $0x54] sm:$0xff]  ;;  %v115_v51 = vmax.f32 %v73_v46, 0.0  ;;  %v116_v53 = vmax.f32 %v74_v48, 0.0  ;;  %v77_v4 = vunpack.c.h.bf16 %v38_v61  ;;  %v80_v5 = vunpack.c.h.bf16 %v40_v62 }
  0x17   :  { %366 = vmatpush.bf16.msra.mxu1 %v773_v24  ;;  %v114_v24 = vmax.f32 %v72_v20, 0.0  ;;  %v67_v27 = vunpack.c.l.bf16 %v32_v23  ;;  %v68_v29 = vunpack.c.h.bf16 %v32_v23  ;;  %v118_v7 = vmax.f32 %v76_v2, 0.0 }
  0x18   :  { %v121_v8 = vmax.f32 %v79_v3, 0.0  ;;  %v119_v9 = vmax.f32 %v77_v4, 0.0  ;;  %v122_v10 = vmax.f32 %v80_v5, 0.0  ;;  %v82_v17 = vunpack.c.l.bf16 %v42_v15 }
  0x19   :  { %v144_v30 = vpack.c.bf16 %v117_v25, %v114_v24  ;;  %v109_v32 = vmax.f32 %v67_v27, 0.0  ;;  %564 = vmatpush.bf16.msra.mxu3 %v786_v13  ;;  %v86_v20 = vunpack.c.h.bf16 %v44_v16  ;;  %v784_v27 = vld [vmem:[%s1102_s2 + $0x18] sm:$0xff] }
  0x1a   :  { %323 = vmatpush.bf16.msra.mxu0 %v764_v33  ;;  %725 = vmatmul.msk.bf16.gmra.mxu2 %vm295_vm0, %v135_v35  ;;  %v107_v33 = vmax.f32 %v65_v28, 0.0  ;;  %v39_v35 = vld [vmem:[%s1101_s0 + $0x80] sm:$0xf]  ;;  %v146_v12 = vpack.c.bf16 %v122_v10, %v119_v9  ;;  %v124_v21 = vmax.f32 %v82_v17, 0.0  ;;  %v783_v28 = vld [vmem:[%s1102_s2 + $0x10] sm:$0xff] }
  0x1b   :  { %367 = vmatpush.bf16.msra.mxu1 %v772_v34  ;;  %v110_v34 = vmax.f32 %v68_v29, 0.0  ;;  %v139_v37 = vpack.c.bf16 %v109_v32, %v106_v31  ;;  %v78_v39 = vunpack.c.l.bf16 %v39_v35  ;;  %v128_v24 = vmax.f32 %v86_v20, 0.0  ;;  %v782_v29 = vld [vmem:[%s1102_s2 + $0x8] sm:$0xff] }
  0x1d   :  { %v140_v38 = vpack.c.bf16 %v110_v34, %v107_v33  ;;  %v120_v43 = vmax.f32 %v78_v39, 0.0  ;;  %565 = vmatpush.bf16.msra.mxu3 %v785_v14 }
  0x1e   :  { %324 = vmatpush.bf16.msra.mxu0 %v763_v40  ;;  %v81_v40 = vunpack.c.l.bf16 %v41_v36 }
  0x1f   :  { %368 = vmatpush.bf16.msra.mxu1 %v771_v41  ;;  %v34_v41 = vld [vmem:[%s1101_s0 + $0x60] sm:$0xff] }
  0x20   :  { %v71_v47 = vunpack.c.h.bf16 %v34_v41 }
  0x21   :  { %325 = vmatmul.bf16.vlgmr.msra.gmra.mxu0 %v130_v44  ;;  %v123_v44 = vmax.f32 %v81_v40, 0.0  ;;  %566 = vmatpush.bf16.msra.mxu3 %v784_v27 }
  0x22   :  { %369 = vmatmul.bf16.vlgmr.msra.gmra.mxu1 %v131_v45  ;;  %v70_v45 = vunpack.c.l.bf16 %v34_v41  ;;  %v113_v52 = vmax.f32 %v71_v47, 0.0 }
  0x23   :  { %v147_v49 = vpack.c.bf16 %v123_v44, %v120_v43 }
  0x24   :  { %v112_v50 = vmax.f32 %v70_v45, 0.0  ;;  %v143_v57 = vpack.c.bf16 %v116_v53, %v113_v52 }
  0x25   :  { %567 = vmatpush.bf16.msra.mxu3 %v783_v28 }
  0x29   :  { %568 = vmatpush.bf16.msra.mxu3 %v782_v29 }
  0x2a   :  { %726 = vmatmul.msk.bf16.gmra.mxu2 %vm295_vm0, %v138_v56  ;;  %v142_v56 = vpack.c.bf16 %v115_v51, %v112_v50 }
  0x31   :  { %330 = vmatmul.bf16.gmra.mxu0 %v133_v63  ;;  %v126_v63 = vmax.f32 %v84_v58, 0.0 }
  0x32   :  { %374 = vmatmul.bf16.gmra.mxu1 %v134_v0  ;;  %v129_v0 = vmax.f32 %v87_v59, 0.0 }
  0x34   :  { %v150_v6 = vpack.c.bf16 %v129_v0, %v126_v63 }
  0x3a   :  { %727 = vmatmul.msk.bf16.gmra.mxu2 %vm295_vm0, %v141_v11  ;;  %v145_v11 = vpack.c.bf16 %v121_v8, %v118_v7 }
  0x41   :  { %335 = vmatmul.bf16.gmra.mxu0 %v136_v18  ;;  %v85_v18 = vunpack.c.l.bf16 %v44_v16 }
  0x42   :  { %379 = vmatmul.bf16.gmra.mxu1 %v137_v19  ;;  %v83_v19 = vunpack.c.h.bf16 %v42_v15 }
  0x43   :  { %v127_v22 = vmax.f32 %v85_v18, 0.0 }
  0x44   :  { %v125_v23 = vmax.f32 %v83_v19, 0.0 }
  0x45   :  { %v148_v25 = vpack.c.bf16 %v127_v22, %v124_v21 }
  0x46   :  { %v149_v26 = vpack.c.bf16 %v128_v24, %v125_v23 }
  0x4a   :  { %728 = vmatmul.msk.bf16.gmra.mxu2 %vm295_vm0, %v144_v30  ;;  %v781_v30 = vld [vmem:[%s1102_s2] sm:$0xff] }
  0x4b   :  { %569 = vmatpush.bf16.msra.mxu3 %v781_v30 }
  0x51   :  { %340 = vmatmul.bf16.gmra.mxu0 %v139_v37 }
  0x52   :  { %384 = vmatmul.bf16.gmra.mxu1 %v140_v38 }
  0x5a   :  { %729 = vmatmul.msk.bf16.gmra.mxu2 %vm295_vm0, %v147_v49 }
  0x61   :  { %345 = vmatmul.bf16.gmra.mxu0 %v142_v56 }
  0x62   :  { %389 = vmatmul.bf16.gmra.mxu1 %v143_v57 }
  0x6a   :  { %730 = vmatmul.msk.bf16.gmra.mxu2 %vm295_vm0, %v150_v6 }
  0x71   :  { %350 = vmatmul.bf16.gmra.mxu0 %v145_v11 }
  0x72   :  { %394 = vmatmul.bf16.gmra.mxu1 %v146_v12 }
  0x81   :  { %355 = vmatmul.bf16.gmra.mxu0 %v148_v25 }
  0x82   :  { %399 = vmatmul.bf16.gmra.mxu1 %v149_v26 }
  0x8d   :  { %v414_v31 = vpop.f32.mrf.mxu2 }
  0x95   :  { %v416_v32 = vpop.f32.mrf.mxu2 }
  0x9d   :  { %v419_v35 = vpop.f32.mrf.mxu2 }
  0x9e   :  { %v326_v33 = vpop.f32.mrf.mxu0 }
  0x9f   :  { %v370_v34 = vpop.f32.mrf.mxu1 }
  0xa0   :  { %v371_v36 = vadd.f32 %v370_v34, %v326_v33 }
  0xa2   :  { %v415_v39 = vadd.f32 %v414_v31, %v371_v36 }
  0xa4   :  { %v449_v43 = vmax.f32 %v415_v39, 0.0 }
  0xa5   :  { %v421_v41 = vpop.f32.mrf.mxu2 }
  0xa6   :  { %v328_v37 = vpop.f32.mrf.mxu0 }
  0xa7   :  { %v372_v38 = vpop.f32.mrf.mxu1 }
  0xa8   :  { %v373_v40 = vadd.f32 %v372_v38, %v328_v37 }
  0xaa   :  { %v417_v42 = vadd.f32 %v416_v32, %v373_v40 }
  0xac   :  { %v450_v44 = vmax.f32 %v417_v42, 0.0 }
  0xad   :  { %v424_v48 = vpop.f32.mrf.mxu2 }
  0xae   :  { %v463_v45 = vpack.c.bf16 %v450_v44, %v449_v43  ;;  %v331_v46 = vpop.f32.mrf.mxu0 }
  0xaf   :  { %v375_v47 = vpop.f32.mrf.mxu1 }
  0xb0   :  { %570 = vmatmul.bf16.vlgmr.msra.gmra.mxu3 %v463_v45  ;;  %v376_v49 = vadd.f32 %v375_v47, %v331_v46 }
  0xb2   :  { %v420_v52 = vadd.f32 %v419_v35, %v376_v49 }
  0xb4   :  { %v451_v56 = vmax.f32 %v420_v52, 0.0 }
  0xb5   :  { %v426_v54 = vpop.f32.mrf.mxu2 }
  0xb6   :  { %v333_v50 = vpop.f32.mrf.mxu0 }
  0xb7   :  { %v377_v51 = vpop.f32.mrf.mxu1 }
  0xb8   :  { %v378_v53 = vadd.f32 %v377_v51, %v333_v50 }
  0xba   :  { %v422_v55 = vadd.f32 %v421_v41, %v378_v53 }
  0xbc   :  { %v452_v57 = vmax.f32 %v422_v55, 0.0 }
  0xbd   :  { %v429_v61 = vpop.f32.mrf.mxu2 }
  0xbe   :  { %v464_v58 = vpack.c.bf16 %v452_v57, %v451_v56  ;;  %v336_v59 = vpop.f32.mrf.mxu0 }
  0xbf   :  { %v380_v60 = vpop.f32.mrf.mxu1 }
  0xc0   :  { %575 = vmatmul.bf16.gmra.mxu3 %v464_v58  ;;  %v381_v62 = vadd.f32 %v380_v60, %v336_v59  ;;  %v790_v58 = vld [vmem:[%s1103_s3] sm:$0xff]  }
  0xc1   :  { %v791_v60 = vunpack.c.l.bf16 %v790_v58 }
  0xc2   :  { %v425_v1 = vadd.f32 %v424_v48, %v381_v62 }
  0xc4   :  { %v453_v4 = vmax.f32 %v425_v1, 0.0 }
  0xc5   :  { %v431_v6 = vpop.f32.mrf.mxu2 }
  0xc6   :  { %v338_v63 = vpop.f32.mrf.mxu0 }
  0xc7   :  { %v382_v0 = vpop.f32.mrf.mxu1 }
  0xc8   :  { %v383_v2 = vadd.f32 %v382_v0, %v338_v63 }
  0xca   :  { %v427_v3 = vadd.f32 %v426_v54, %v383_v2 }
  0xcc   :  { %v454_v5 = vmax.f32 %v427_v3, 0.0 }
  0xcd   :  { %v434_v11 = vpop.f32.mrf.mxu2 }
  0xce   :  { %v465_v7 = vpack.c.bf16 %v454_v5, %v453_v4  ;;  %v341_v8 = vpop.f32.mrf.mxu0  ;;  %v852_v4 = vld [vmem:[%s1103_s3 + $0x8] sm:$0xff]  }
  0xcf   :  { %v385_v9 = vpop.f32.mrf.mxu1 }
  0xd0   :  { %580 = vmatmul.bf16.gmra.mxu3 %v465_v7  ;;  %v386_v10 = vadd.f32 %v385_v9, %v341_v8  ;;  %v796_v7 = vunpack.c.h.bf16 %v852_v4 }
  0xd2   :  { %v430_v14 = vadd.f32 %v429_v61, %v386_v10  ;;  %v792_v61 = vunpack.c.h.bf16 %v790_v58 }
  0xd4   :  { %v455_v17 = vmax.f32 %v430_v14, 0.0  ;;  %v853_v14 = vld [vmem:[%s1103_s3 + $0x10] sm:$0xff]  }
  0xd5   :  { %v436_v22 = vpop.f32.mrf.mxu2 }
  0xd6   :  { %v343_v12 = vpop.f32.mrf.mxu0 }
  0xd7   :  { %v387_v13 = vpop.f32.mrf.mxu1 }
  0xd8   :  { %v388_v15 = vadd.f32 %v387_v13, %v343_v12 }
  0xda   :  { %v432_v16 = vadd.f32 %v431_v6, %v388_v15  ;;  %v795_v6 = vunpack.c.l.bf16 %v852_v4 }
  0xdc   :  { %v456_v18 = vmax.f32 %v432_v16, 0.0  ;;  %v799_v16 = vunpack.c.l.bf16 %v853_v14 }
  0xdd   :  { %v439_v29 = vpop.f32.mrf.mxu2 }
  0xde   :  { %v466_v19 = vpack.c.bf16 %v456_v18, %v455_v17  ;;  %v346_v20 = vpop.f32.mrf.mxu0  ;;  %v800_v17 = vunpack.c.h.bf16 %v853_v14 }
  0xdf   :  { %v390_v21 = vpop.f32.mrf.mxu1 }
  0xe0   :  { %585 = vmatmul.bf16.gmra.mxu3 %v466_v19  ;;  %v391_v23 = vadd.f32 %v390_v21, %v346_v20 }
  0xe2   :  { %v435_v26 = vadd.f32 %v434_v11, %v391_v23 }
  0xe4   :  { %v457_v30 = vmax.f32 %v435_v26, 0.0 }
  0xe5   :  { %v441_v36 = vpop.f32.mrf.mxu2 }
  0xe6   :  { %v348_v24 = vpop.f32.mrf.mxu0 }
  0xe7   :  { %v392_v25 = vpop.f32.mrf.mxu1 }
  0xe8   :  { %v393_v27 = vadd.f32 %v392_v25, %v348_v24  ;;  %v854_v24 = vld [vmem:[%s1103_s3 + $0x18] sm:$0xff]  }
  0xe9   :  { %v803_v26 = vunpack.c.l.bf16 %v854_v24 }
  0xea   :  { %v437_v28 = vadd.f32 %v436_v22, %v393_v27  ;;  %v804_v27 = vunpack.c.h.bf16 %v854_v24 }
  0xec   :  { %v458_v31 = vmax.f32 %v437_v28, 0.0 }
  0xed   :  { %v444_v44 = vpop.f32.mrf.mxu2 }
  0xee   :  { %v467_v32 = vpack.c.bf16 %v458_v31, %v457_v30  ;;  %v351_v33 = vpop.f32.mrf.mxu0 }
  0xef   :  { %v395_v34 = vpop.f32.mrf.mxu1 }
  0xf0   :  { %590 = vmatmul.bf16.gmra.mxu3 %v467_v32  ;;  %v396_v35 = vadd.f32 %v395_v34, %v351_v33  ;;  %v855_v34 = vld [vmem:[%s1103_s3 + $0x20] sm:$0xff]  }
  0xf2   :  { %v440_v39 = vadd.f32 %v439_v29, %v396_v35 }
  0xf4   :  { %v459_v42 = vmax.f32 %v440_v39, 0.0 }
  0xf5   :  { %v446_v53 = vpop.f32.mrf.mxu2 }
  0xf6   :  { %v353_v37 = vpop.f32.mrf.mxu0 }
  0xf7   :  { %v397_v38 = vpop.f32.mrf.mxu1 }
  0xf8   :  { %v398_v40 = vadd.f32 %v397_v38, %v353_v37  ;;  %v808_v37 = vunpack.c.h.bf16 %v855_v34 }
  0xfa   :  { %v442_v41 = vadd.f32 %v441_v36, %v398_v40  ;;  %v807_v36 = vunpack.c.l.bf16 %v855_v34 }
  0xfc   :  { %v460_v43 = vmax.f32 %v442_v41, 0.0 }
  0xfe   :  { %v468_v45 = vpack.c.bf16 %v460_v43, %v459_v42  ;;  %v356_v46 = vpop.f32.mrf.mxu0 }
  0xff   :  { %v400_v47 = vpop.f32.mrf.mxu1 }
 0x100   :  { %595 = vmatmul.bf16.gmra.mxu3 %v468_v45  ;;  %v401_v48 = vadd.f32 %v400_v47, %v356_v46 }
 0x102   :  { %v445_v51 = vadd.f32 %v444_v44, %v401_v48  ;;  %v856_v44 = vld [vmem:[%s1103_s3 + $0x28] sm:$0xff]  }
 0x103   :  { %v811_v46 = vunpack.c.l.bf16 %v856_v44  ;;  %v812_v47 = vunpack.c.h.bf16 %v856_v44 }
 0x104   :  { %v461_v55 = vmax.f32 %v445_v51, 0.0 }
 0x106   :  { %v358_v49 = vpop.f32.mrf.mxu0 }
 0x107   :  { %v402_v50 = vpop.f32.mrf.mxu1 }
 0x108   :  { %v403_v52 = vadd.f32 %v402_v50, %v358_v49 }
 0x10a   :  { %v447_v54 = vadd.f32 %v446_v53, %v403_v52 }
 0x10c   :  { %v462_v56 = vmax.f32 %v447_v54, 0.0  ;;  %v857_v54 = vld [vmem:[%s1103_s3 + $0x30] sm:$0xff]  }
 0x10e   :  { %v469_v57 = vpack.c.bf16 %v462_v56, %v461_v55  ;;  %v815_v56 = vunpack.c.l.bf16 %v857_v54 }
 0x110   :  { %600 = vmatmul.bf16.gmra.mxu3 %v469_v57  ;;  %v816_v57 = vunpack.c.h.bf16 %v857_v54 }
 0x133   :  { %v571_v59 = vpop.f32.mrf.mxu3 }
 0x134   :  { %v572_v62 = vadd.f32 %v791_v60, %v571_v59 }
 0x136   :  { %v606_v1 = vmax.f32 %v572_v62, 0.0 }
 0x13b   :  { %v573_v63 = vpop.f32.mrf.mxu3 }
 0x13c   :  { %v574_v0 = vadd.f32 %v792_v61, %v573_v63 }
 0x13e   :  { %v607_v2 = vmax.f32 %v574_v0, 0.0 }
 0x140   :  { %v820_v3 = vpack.c.bf16 %v607_v2, %v606_v1 }
 0x142   :  { %821 = vst [vmem:[%s1104_s4] sm:$0xff] %v820_v3  }
 0x143   :  { %v576_v5 = vpop.f32.mrf.mxu3 }
 0x144   :  { %v577_v8 = vadd.f32 %v795_v6, %v576_v5 }
 0x146   :  { %v608_v11 = vmax.f32 %v577_v8, 0.0 }
 0x14b   :  { %v578_v9 = vpop.f32.mrf.mxu3 }
 0x14c   :  { %v579_v10 = vadd.f32 %v796_v7, %v578_v9 }
 0x14e   :  { %v609_v12 = vmax.f32 %v579_v10, 0.0 }
 0x150   :  { %v825_v13 = vpack.c.bf16 %v609_v12, %v608_v11 }
 0x152   :  { %858 = vst [vmem:[%s1104_s4 + $0x8] sm:$0xff] %v825_v13  }
 0x153   :  { %v581_v15 = vpop.f32.mrf.mxu3 }
 0x154   :  { %v582_v18 = vadd.f32 %v799_v16, %v581_v15 }
 0x156   :  { %v610_v21 = vmax.f32 %v582_v18, 0.0 }
 0x15b   :  { %v583_v19 = vpop.f32.mrf.mxu3 }
 0x15c   :  { %v584_v20 = vadd.f32 %v800_v17, %v583_v19 }
 0x15e   :  { %v611_v22 = vmax.f32 %v584_v20, 0.0 }
 0x160   :  { %v830_v23 = vpack.c.bf16 %v611_v22, %v610_v21 }
 0x162   :  { %859 = vst [vmem:[%s1104_s4 + $0x10] sm:$0xff] %v830_v23  }
 0x163   :  { %v586_v25 = vpop.f32.mrf.mxu3 }
 0x164   :  { %v587_v28 = vadd.f32 %v803_v26, %v586_v25 }
 0x166   :  { %v612_v31 = vmax.f32 %v587_v28, 0.0 }
 0x16b   :  { %v588_v29 = vpop.f32.mrf.mxu3 }
 0x16c   :  { %v589_v30 = vadd.f32 %v804_v27, %v588_v29 }
 0x16e   :  { %v613_v32 = vmax.f32 %v589_v30, 0.0 }
 0x170   :  { %v835_v33 = vpack.c.bf16 %v613_v32, %v612_v31 }
 0x172   :  { %860 = vst [vmem:[%s1104_s4 + $0x18] sm:$0xff] %v835_v33  }
 0x173   :  { %v591_v35 = vpop.f32.mrf.mxu3 }
 0x174   :  { %v592_v38 = vadd.f32 %v807_v36, %v591_v35 }
 0x176   :  { %v614_v41 = vmax.f32 %v592_v38, 0.0 }
 0x17b   :  { %v593_v39 = vpop.f32.mrf.mxu3 }
 0x17c   :  { %v594_v40 = vadd.f32 %v808_v37, %v593_v39 }
 0x17e   :  { %v615_v42 = vmax.f32 %v594_v40, 0.0 }
 0x180   :  { %v840_v43 = vpack.c.bf16 %v615_v42, %v614_v41 }
 0x182   :  { %861 = vst [vmem:[%s1104_s4 + $0x20] sm:$0xff] %v840_v43  }
 0x183   :  { %v596_v45 = vpop.f32.mrf.mxu3 }
 0x184   :  { %v597_v48 = vadd.f32 %v811_v46, %v596_v45 }
 0x186   :  { %v616_v51 = vmax.f32 %v597_v48, 0.0 }
 0x18b   :  { %v598_v49 = vpop.f32.mrf.mxu3 }
 0x18c   :  { %v599_v50 = vadd.f32 %v812_v47, %v598_v49 }
 0x18e   :  { %v617_v52 = vmax.f32 %v599_v50, 0.0 }
 0x190   :  { %v845_v53 = vpack.c.bf16 %v617_v52, %v616_v51 }
 0x192   :  { %862 = vst [vmem:[%s1104_s4 + $0x28] sm:$0xff] %v845_v53  }
 0x193   :  { %v601_v55 = vpop.f32.mrf.mxu3 }
 0x194   :  { %v602_v58 = vadd.f32 %v815_v56, %v601_v55 }
 0x196   :  { %v618_v61 = vmax.f32 %v602_v58, 0.0 }
 0x19b   :  { %v603_v59 = vpop.f32.mrf.mxu3 }
 0x19c   :  { %v604_v60 = vadd.f32 %v816_v57, %v603_v59 }
 0x19e   :  { %v619_v62 = vmax.f32 %v604_v60, 0.0 }
 0x1a0   :  { %v850_v63 = vpack.c.bf16 %v619_v62, %v618_v61 }
 0x1a2   :  { %863 = vst [vmem:[%s1104_s4 + $0x30] sm:$0xff] %v850_v63  }

// kernel: decoder_forward.8
= control target key start
LH: loop header
LB: loop body
LE: loop exit
PB: predicated region body
PF: predicated region fallthrough
CT: control target
= control target key end

     0   :  { %s458_s1 = inlined_call_operand.vmem [shape: bf16[128,128], index: 1, kind: input, shape index: {}]   ;;  %s459_s2 = inlined_call_operand.vmem [shape: f32[1,128], index: 2, kind: input, shape index: {}]   ;;  %s460_s0 = inlined_call_operand.vmem [shape: bf16[112,128], index: 0, kind: input, shape index: {}]   ;;  %s461_s3 = inlined_call_operand.vmem [shape: bf16[112,128], index: 3, kind: output, shape index: {}]  }
   0x1   :  { %v302_v0 = vld [vmem:[%s458_s1 + $0x38] sm:$0xff]  ;;  %v301_v1 = vld [vmem:[%s458_s1 + $0x30] sm:$0xff]  ;;  %v300_v2 = vld [vmem:[%s458_s1 + $0x28] sm:$0xff] }
   0x2   :  { %344 = vmatpush.bf16.msra.mxu1 %v302_v0  ;;  %345 = vmatpush.bf16.msra.mxu2 %v302_v0  ;;  %v299_v3 = vld [vmem:[%s458_s1 + $0x20] sm:$0xff]  ;;  %v298_v4 = vld [vmem:[%s458_s1 + $0x18] sm:$0xff]  ;;  %v297_v5 = vld [vmem:[%s458_s1 + $0x10] sm:$0xff] }
   0x3   :  { %346 = vmatpush.bf16.msra.mxu3 %v302_v0  ;;  %138 = vmatpush.bf16.msra.mxu0 %v302_v0  ;;  %v296_v6 = vld [vmem:[%s458_s1 + $0x8] sm:$0xff]  ;;  %v295_v7 = vld [vmem:[%s458_s1] sm:$0xff]  ;;  %v291_v9 = vld [vmem:[%s460_s0 + $0x18] sm:$0xff] }
   0x4   :  { %v289_v8 = vld [vmem:[%s460_s0 + $0x8] sm:$0xff]  ;;  %v288_v11 = vld [vmem:[%s460_s0] sm:$0xff]  ;;  %v290_v12 = vld [vmem:[%s460_s0 + $0x10] sm:$0xff] }
   0x5   :  { %v293_v10 = vld [vmem:[%s460_s0 + $0x28] sm:$0xff]  ;;  %v292_v13 = vld [vmem:[%s460_s0 + $0x20] sm:$0xff]  ;;  %v294_v14 = vld [vmem:[%s460_s0 + $0x30] sm:$0xff] }
   0x6   :  { %347 = vmatpush.bf16.msra.mxu1 %v301_v1  ;;  %348 = vmatpush.bf16.msra.mxu2 %v301_v1  ;;  %v368_v17 = vld [vmem:[%s459_s2] ss:$0 sm:$0xff] }
   0x7   :  { %349 = vmatpush.bf16.msra.mxu3 %v301_v1  ;;  %139 = vmatpush.bf16.msra.mxu0 %v301_v1 }
   0xa   :  { %350 = vmatpush.bf16.msra.mxu1 %v300_v2  ;;  %351 = vmatpush.bf16.msra.mxu2 %v300_v2 }
   0xb   :  { %352 = vmatpush.bf16.msra.mxu3 %v300_v2  ;;  %140 = vmatpush.bf16.msra.mxu0 %v300_v2 }
   0xe   :  { %353 = vmatpush.bf16.msra.mxu1 %v299_v3  ;;  %354 = vmatpush.bf16.msra.mxu2 %v299_v3 }
   0xf   :  { %355 = vmatpush.bf16.msra.mxu3 %v299_v3  ;;  %141 = vmatpush.bf16.msra.mxu0 %v299_v3 }
  0x12   :  { %356 = vmatpush.bf16.msra.mxu1 %v298_v4  ;;  %357 = vmatpush.bf16.msra.mxu2 %v298_v4 }
  0x13   :  { %358 = vmatpush.bf16.msra.mxu3 %v298_v4  ;;  %142 = vmatpush.bf16.msra.mxu0 %v298_v4 }
  0x16   :  { %359 = vmatpush.bf16.msra.mxu1 %v297_v5  ;;  %360 = vmatpush.bf16.msra.mxu2 %v297_v5 }
  0x17   :  { %361 = vmatpush.bf16.msra.mxu3 %v297_v5  ;;  %143 = vmatpush.bf16.msra.mxu0 %v297_v5 }
  0x1a   :  { %362 = vmatpush.bf16.msra.mxu1 %v296_v6  ;;  %363 = vmatpush.bf16.msra.mxu2 %v296_v6 }
  0x1b   :  { %364 = vmatpush.bf16.msra.mxu3 %v296_v6  ;;  %144 = vmatpush.bf16.msra.mxu0 %v296_v6 }
  0x1e   :  { %365 = vmatpush.bf16.msra.mxu1 %v295_v7  ;;  %366 = vmatpush.bf16.msra.mxu2 %v295_v7 }
  0x1f   :  { %367 = vmatpush.bf16.msra.mxu3 %v295_v7  ;;  %145 = vmatpush.bf16.msra.mxu0 %v295_v7 }
  0x21   :  { %151 = vmatmul.bf16.vlgmr.msra.gmra.mxu1 %v289_v8  ;;  %161 = vmatmul.bf16.vlgmr.msra.gmra.mxu2 %v291_v9 }
  0x22   :  { %171 = vmatmul.bf16.vlgmr.msra.gmra.mxu3 %v293_v10  ;;  %146 = vmatmul.bf16.vlgmr.msra.gmra.mxu0 %v288_v11 }
  0x31   :  { %156 = vmatmul.bf16.gmra.mxu1 %v290_v12  ;;  %166 = vmatmul.bf16.gmra.mxu2 %v292_v13 }
  0x32   :  { %176 = vmatmul.bf16.gmra.mxu3 %v294_v14 }
  0x9e   :  { %v152_v15 = vpop.f32.mrf.mxu1 }
  0x9f   :  { %v147_v16 = vpop.f32.mrf.mxu0  ;;  %v153_v20 = vadd.f32 %v368_v17, %v152_v15 }
  0xa0   :  { %v148_v19 = vadd.f32 %v368_v17, %v147_v16 }
  0xa1   :  { %v184_v27 = vmax.f32 %v153_v20, 0.0 }
  0xa2   :  { %v182_v25 = vmax.f32 %v148_v19, 0.0 }
  0xa4   :  { %v162_v18 = vpop.f32.mrf.mxu2 }
  0xa5   :  { %v172_v21 = vpop.f32.mrf.mxu3  ;;  %v163_v30 = vadd.f32 %v368_v17, %v162_v18 }
  0xa6   :  { %v154_v22 = vpop.f32.mrf.mxu1  ;;  %v173_v32 = vadd.f32 %v368_v17, %v172_v21 }
  0xa7   :  { %v155_v23 = vadd.f32 %v368_v17, %v154_v22  ;;  %v149_v24 = vpop.f32.mrf.mxu0  ;;  %v188_v39 = vmax.f32 %v163_v30, 0.0 }
  0xa8   :  { %v150_v26 = vadd.f32 %v368_v17, %v149_v24  ;;  %v192_v41 = vmax.f32 %v173_v32, 0.0 }
  0xa9   :  { %v185_v28 = vmax.f32 %v155_v23, 0.0 }
  0xaa   :  { %v183_v29 = vmax.f32 %v150_v26, 0.0 }
  0xab   :  { %v311_v31 = vpack.c.bf16 %v185_v28, %v184_v27 }
  0xac   :  { %v164_v33 = vpop.f32.mrf.mxu2  ;;  %v306_v34 = vpack.c.bf16 %v183_v29, %v182_v25 }
  0xad   :  { %338 = vst [vmem:[%s461_s3 + $0x8] sm:$0xff] %v311_v31   ;;  %v165_v35 = vadd.f32 %v368_v17, %v164_v33  ;;  %v174_v36 = vpop.f32.mrf.mxu3 }
  0xae   :  { %v175_v37 = vadd.f32 %v368_v17, %v174_v36  ;;  %v157_v38 = vpop.f32.mrf.mxu1  ;;  %307 = vst [vmem:[%s461_s3] sm:$0xff] %v306_v34  }
  0xaf   :  { %v189_v40 = vmax.f32 %v165_v35, 0.0  ;;  %v158_v46 = vadd.f32 %v368_v17, %v157_v38 }
  0xb0   :  { %v193_v42 = vmax.f32 %v175_v37, 0.0 }
  0xb1   :  { %v321_v43 = vpack.c.bf16 %v189_v40, %v188_v39  ;;  %v186_v50 = vmax.f32 %v158_v46, 0.0 }
  0xb2   :  { %v331_v44 = vpack.c.bf16 %v193_v42, %v192_v41 }
  0xb3   :  { %340 = vst [vmem:[%s461_s3 + $0x18] sm:$0xff] %v321_v43  }
  0xb4   :  { %342 = vst [vmem:[%s461_s3 + $0x28] sm:$0xff] %v331_v44   ;;  %v167_v45 = vpop.f32.mrf.mxu2 }
  0xb5   :  { %v177_v47 = vpop.f32.mrf.mxu3  ;;  %v168_v52 = vadd.f32 %v368_v17, %v167_v45 }
  0xb6   :  { %v159_v48 = vpop.f32.mrf.mxu1  ;;  %v178_v54 = vadd.f32 %v368_v17, %v177_v47 }
  0xb7   :  { %v160_v49 = vadd.f32 %v368_v17, %v159_v48  ;;  %v190_v59 = vmax.f32 %v168_v52, 0.0 }
  0xb8   :  { %v194_v61 = vmax.f32 %v178_v54, 0.0 }
  0xb9   :  { %v187_v51 = vmax.f32 %v160_v49, 0.0 }
  0xbb   :  { %v316_v53 = vpack.c.bf16 %v187_v51, %v186_v50 }
  0xbc   :  { %v169_v55 = vpop.f32.mrf.mxu2 }
  0xbd   :  { %339 = vst [vmem:[%s461_s3 + $0x10] sm:$0xff] %v316_v53   ;;  %v170_v56 = vadd.f32 %v368_v17, %v169_v55  ;;  %v179_v57 = vpop.f32.mrf.mxu3 }
  0xbe   :  { %v180_v58 = vadd.f32 %v368_v17, %v179_v57 }
  0xbf   :  { %v191_v60 = vmax.f32 %v170_v56, 0.0 }
  0xc0   :  { %v195_v62 = vmax.f32 %v180_v58, 0.0 }
  0xc1   :  { %v326_v63 = vpack.c.bf16 %v191_v60, %v190_v59 }
  0xc2   :  { %v336_v0 = vpack.c.bf16 %v195_v62, %v194_v61 }
  0xc3   :  { %341 = vst [vmem:[%s461_s3 + $0x20] sm:$0xff] %v326_v63  }
  0xc4   :  { %343 = vst [vmem:[%s461_s3 + $0x30] sm:$0xff] %v336_v0  }

// kernel: decoder_forward.9
= control target key start
LH: loop header
LB: loop body
LE: loop exit
PB: predicated region body
PF: predicated region fallthrough
CT: control target
= control target key end

     0   :  { %s695_s12 = smov 0   ;;  %s782_s0 = inlined_call_operand.vmem [shape: bf16[352,64], index: 0, kind: input, shape index: {}]   ;;  %s783_s1 = inlined_call_operand.vmem [shape: bf16[64,128], index: 1, kind: input, shape index: {}]   ;;  %s784_s2 = inlined_call_operand.vmem [shape: f32[1,128], index: 2, kind: input, shape index: {}]   ;;  %s785_s3 = inlined_call_operand.vmem [shape: bf16[352,128], index: 3, kind: output, shape index: {}]  }
   0x1 LB: > { %s486_s13 = sadd.s32 4294967295, %s673_s12   ;;  %p490_p0 = scmp.ge.s32.totalorder %s673_s12, 1  ;;  %s673_s12 = sphi %s695_s12, %s13_s12  }
   0x2   : > { %p138_p1 = scmp.lt.s32.totalorder %s673_s12, 3 }
   0x4   : > { %p139_p2 = pnand %p490_p0, %p138_p1 }
   0x5   : > { %s162_s16 = smul.u32 (!%p139_p2), 22, %s486_s13 }
   0x6   : > { %142 = sbr.rel (%p139_p2) target bundleno = 205 (0xcd), region = 32 }
   0x7   : > { %p163_p3 = scmp.lt.s32.totalorder (!%p139_p2), %s162_s16, 43 }
   0xb   : > { %v580_v0 = vld [vmem:[%s783_s1 + $0x18] sm:$0xff]  ;;  %v579_v1 = vld [vmem:[%s783_s1 + $0x10] sm:$0xff]  ;;  %s787_s16 = smov (!%p163_p3, %s162_s16), 43  ;;  %v578_v2 = vld [vmem:[%s783_s1 + $0x8] sm:$0xff]  ;;  %vm288_vm0 = vcmask 523264  }
   0xc   : > { %326 = vmatpush.bf16.msra.mxu0 %v580_v0  ;;  %646 = vmatpush.bf16.msra.mxu1 %v580_v0  ;;  %s491_s21 = sshll.u32 %s787_s16, 2  ;;  %v577_v3 = vld [vmem:[%s783_s1] sm:$0xff] }
   0xd   : > { %647 = vmatpush.bf16.msra.mxu2 %v580_v0  ;;  %648 = vmatpush.bf16.msra.mxu3 %v580_v0  ;;  %s166_s26 = scalar_lea.vmem %s782_s0, %s491_s21  ;;  %v737_v17 = vld [vmem:[%s784_s2] ss:$0 sm:$0xff]  ;;  %s748_s4 = scalar_lea.vmem %s785_s3, %s491_s21 }
   0xe   : > { %v566_v4 = vld [vmem:[%s166_s26] sm:$0xff]  ;;  %v569_v5 = vld [vmem:[%s166_s26 + $0x18] sm:$0xff]  ;;  %v572_v6 = vld [vmem:[%s166_s26 + $0x30] sm:$0xff] }
   0xf   : > { %v575_v7 = vld [vmem:[%s166_s26 + $0x48] sm:$0xff]  ;;  %v570_v9 = vld [vmem:[%s166_s26 + $0x20] sm:$0xff]  ;;  %v573_v10 = vld [vmem:[%s166_s26 + $0x38] sm:$0xff] }
  0x10   : > { %327 = vmatpush.bf16.msra.mxu0 %v579_v1  ;;  %649 = vmatpush.bf16.msra.mxu1 %v579_v1  ;;  %v567_v8 = vld [vmem:[%s166_s26 + $0x8] sm:$0xff]  ;;  %v576_v11 = vld [vmem:[%s166_s26 + $0x50] sm:$0xff]  ;;  %v574_v14 = vld [vmem:[%s166_s26 + $0x40] sm:$0xff] }
  0x11   : > { %650 = vmatpush.bf16.msra.mxu2 %v579_v1  ;;  %651 = vmatpush.bf16.msra.mxu3 %v579_v1  ;;  %v568_v12 = vld [vmem:[%s166_s26 + $0x10] sm:$0xff]  ;;  %v571_v13 = vld [vmem:[%s166_s26 + $0x28] sm:$0xff] }
  0x14   : > { %328 = vmatpush.bf16.msra.mxu0 %v578_v2  ;;  %652 = vmatpush.bf16.msra.mxu1 %v578_v2 }
  0x15   : > { %653 = vmatpush.bf16.msra.mxu2 %v578_v2  ;;  %654 = vmatpush.bf16.msra.mxu3 %v578_v2 }
  0x18   : > { %329 = vmatpush.bf16.msra.mxu0 %v577_v3  ;;  %655 = vmatpush.bf16.msra.mxu1 %v577_v3 }
  0x19   : > { %656 = vmatpush.bf16.msra.mxu2 %v577_v3  ;;  %657 = vmatpush.bf16.msra.mxu3 %v577_v3 }
  0x1b   : > { %553 = vmatmul.msk.bf16.vlgmr.msra.gmra.mxu0 %vm288_vm0, %v566_v4  ;;  %556 = vmatmul.msk.bf16.vlgmr.msra.gmra.mxu1 %vm288_vm0, %v569_v5 }
  0x1c   : > { %559 = vmatmul.msk.bf16.vlgmr.msra.gmra.mxu2 %vm288_vm0, %v572_v6  ;;  %562 = vmatmul.msk.bf16.vlgmr.msra.gmra.mxu3 %vm288_vm0, %v575_v7 }
  0x2b   : > { %554 = vmatmul.msk.bf16.gmra.mxu0 %vm288_vm0, %v567_v8  ;;  %557 = vmatmul.msk.bf16.gmra.mxu1 %vm288_vm0, %v570_v9 }
  0x2c   : > { %560 = vmatmul.msk.bf16.gmra.mxu2 %vm288_vm0, %v573_v10  ;;  %563 = vmatmul.msk.bf16.gmra.mxu3 %vm288_vm0, %v576_v11 }
  0x3b   : > { %555 = vmatmul.msk.bf16.gmra.mxu0 %vm288_vm0, %v568_v12  ;;  %558 = vmatmul.msk.bf16.gmra.mxu1 %vm288_vm0, %v571_v13 }
  0x3c   : > { %561 = vmatmul.msk.bf16.gmra.mxu2 %vm288_vm0, %v574_v14 }
  0x98   : > { %v331_v15 = vpop.f32.mrf.mxu0  ;;  %v346_v16 = vpop.f32.mrf.mxu1 }
  0x99   : > { %v332_v22 = vadd.f32 %v737_v17, %v331_v15  ;;  %v347_v23 = vadd.f32 %v737_v17, %v346_v16 }
  0x9f   : > { %v361_v18 = vpop.f32.mrf.mxu2  ;;  %v376_v19 = vpop.f32.mrf.mxu3 }
  0xa0   : > { %v333_v20 = vpop.f32.mrf.mxu0  ;;  %v348_v21 = vpop.f32.mrf.mxu1  ;;  %v377_v28 = vadd.f32 %v737_v17, %v376_v19  ;;  %v362_v31 = vadd.f32 %v737_v17, %v361_v18 }
  0xa1   : > { %v334_v24 = vadd.f32 %v737_v17, %v333_v20  ;;  %v349_v25 = vadd.f32 %v737_v17, %v348_v21 }
  0xa3   : > { %v584_v26 = vpack.c.bf16 %v334_v24, %v332_v22  ;;  %v599_v27 = vpack.c.bf16 %v349_v25, %v347_v23 }
  0xa5   : > { %585 = vst [vmem:[%s748_s4] sm:$0xff] %v584_v26  }
  0xa6   : > { %638 = vst [vmem:[%s748_s4 + $0x18] sm:$0xff] %v599_v27  }
  0xa7   : > { %v363_v29 = vpop.f32.mrf.mxu2  ;;  %v378_v30 = vpop.f32.mrf.mxu3 }
  0xa8   : > { %v364_v32 = vadd.f32 %v737_v17, %v363_v29  ;;  %v336_v33 = vpop.f32.mrf.mxu0  ;;  %v351_v34 = vpop.f32.mrf.mxu1  ;;  %v379_v35 = vadd.f32 %v737_v17, %v378_v30 }
  0xa9   : > { %v337_v42 = vadd.f32 %v737_v17, %v336_v33  ;;  %v352_v43 = vadd.f32 %v737_v17, %v351_v34 }
  0xaa   : > { %v614_v36 = vpack.c.bf16 %v364_v32, %v362_v31  ;;  %v629_v37 = vpack.c.bf16 %v379_v35, %v377_v28 }
  0xac   : > { %641 = vst [vmem:[%s748_s4 + $0x30] sm:$0xff] %v614_v36  }
  0xad   : > { %644 = vst [vmem:[%s748_s4 + $0x48] sm:$0xff] %v629_v37  }
  0xaf   : > { %v366_v38 = vpop.f32.mrf.mxu2  ;;  %v381_v39 = vpop.f32.mrf.mxu3 }
  0xb0   : > { %v338_v40 = vpop.f32.mrf.mxu0  ;;  %v353_v41 = vpop.f32.mrf.mxu1  ;;  %v382_v48 = vadd.f32 %v737_v17, %v381_v39  ;;  %v367_v51 = vadd.f32 %v737_v17, %v366_v38 }
  0xb1   : > { %v339_v44 = vadd.f32 %v737_v17, %v338_v40  ;;  %v354_v45 = vadd.f32 %v737_v17, %v353_v41 }
  0xb3   : > { %v589_v46 = vpack.c.bf16 %v339_v44, %v337_v42  ;;  %v604_v47 = vpack.c.bf16 %v354_v45, %v352_v43 }
  0xb5   : > { %636 = vst [vmem:[%s748_s4 + $0x8] sm:$0xff] %v589_v46  }
  0xb6   : > { %639 = vst [vmem:[%s748_s4 + $0x20] sm:$0xff] %v604_v47  }
  0xb7   : > { %v368_v49 = vpop.f32.mrf.mxu2  ;;  %v383_v50 = vpop.f32.mrf.mxu3 }
  0xb8   : > { %v369_v52 = vadd.f32 %v737_v17, %v368_v49  ;;  %v341_v53 = vpop.f32.mrf.mxu0  ;;  %v356_v54 = vpop.f32.mrf.mxu1  ;;  %v384_v55 = vadd.f32 %v737_v17, %v383_v50 }
  0xb9   : > { %v342_v61 = vadd.f32 %v737_v17, %v341_v53  ;;  %v357_v62 = vadd.f32 %v737_v17, %v356_v54 }
  0xba   : > { %v619_v56 = vpack.c.bf16 %v369_v52, %v367_v51  ;;  %v634_v57 = vpack.c.bf16 %v384_v55, %v382_v48 }
  0xbc   : > { %642 = vst [vmem:[%s748_s4 + $0x38] sm:$0xff] %v619_v56  }
  0xbd   : > { %645 = vst [vmem:[%s748_s4 + $0x50] sm:$0xff] %v634_v57  }
  0xbf   : > { %v371_v58 = vpop.f32.mrf.mxu2 }
  0xc0   : > { %v343_v59 = vpop.f32.mrf.mxu0  ;;  %v358_v60 = vpop.f32.mrf.mxu1  ;;  %v372_v4 = vadd.f32 %v737_v17, %v371_v58 }
  0xc1   : > { %v344_v63 = vadd.f32 %v737_v17, %v343_v59  ;;  %v359_v0 = vadd.f32 %v737_v17, %v358_v60 }
  0xc3   : > { %v594_v1 = vpack.c.bf16 %v344_v63, %v342_v61  ;;  %v609_v2 = vpack.c.bf16 %v359_v0, %v357_v62 }
  0xc5   : > { %637 = vst [vmem:[%s748_s4 + $0x10] sm:$0xff] %v594_v1  }
  0xc6   : > { %640 = vst [vmem:[%s748_s4 + $0x28] sm:$0xff] %v609_v2  }
  0xc7   : > { %v373_v3 = vpop.f32.mrf.mxu2 }
  0xc8   : > { %v374_v5 = vadd.f32 %v737_v17, %v373_v3 }
  0xca   : > { %v624_v6 = vpack.c.bf16 %v374_v5, %v372_v4 }
  0xcc   : > { %643 = vst [vmem:[%s748_s4 + $0x40] sm:$0xff] %v624_v6  }
  0xcd PF: > { %s13_s12 = sadd.s32 1, %s673_s12  }
  0xce   : > { %p10_p4 = scmp.ge.s32.totalorder %s13_s12, 4  }
  0xd0   :  { %12 = sbr.rel (!%p10_p4) target bundleno = 1 (0x1), region = 62 }

</bundles_post_ra>
